<compile_context>
chip_gen: v7x
topology: tpu7x:2x2x1
jax: 0.10.0
libtpu: 0.0.40
codegen_flags: <defaults>
</compile_context>

<pallas_src>
import jax
import jax.numpy as jnp
from jax.experimental import pallas as pl
from jax.experimental.pallas import tpu as pltpu


def _lstm_mlp_kernel(
    x_ref,      # (T_CHUNK, BLOCK_B, D)  f32 VMEM  (time-major chunk)
    lens_ref,   # (BLOCK_B, 1)           int32 VMEM
    wih_ref,    # (D, 4H)                bf16 VMEM  (gate order i,f,o,g)
    whh_ref,    # (H, 4H)                bf16 VMEM
    b_ref,      # (1, 4H)                f32 VMEM   (bias_ih + bias_hh)
    w1_ref,     # (H, H2)                bf16 VMEM
    b1_ref,     # (1, H2)                f32 VMEM
    w2_ref,     # (H2, OUTp)             bf16 VMEM  (lane-padded to 128)
    b2_ref,     # (1, OUTp)              f32 VMEM
    out_ref,    # (BLOCK_B, OUTp)        f32 VMEM
    h_ref,      # (BLOCK_B, H)           f32 VMEM scratch (persists over t)
    c_ref,      # (BLOCK_B, H)           f32 VMEM scratch
):
    t_blk = pl.program_id(1)
    n_t = pl.num_programs(1)
    T_CHUNK, BLOCK_B, D = x_ref.shape
    H = whh_ref.shape[0]

    # --- init recurrent state at the first time chunk of this batch block.
    @pl.when(t_blk == 0)
    def _():
        h_ref[...] = jnp.zeros_like(h_ref)
        c_ref[...] = jnp.zeros_like(c_ref)

    # --- Hoisted input projection: ONE bf16 MXU contraction for the whole
    # chunk, f32 accumulation.  (T_CHUNK*BLOCK_B, D) @ (D, 4H) + bias.
    x2 = x_ref[...].reshape(T_CHUNK * BLOCK_B, D)
    gx = (
        jnp.dot(x2.astype(jnp.bfloat16), wih_ref[...],
                preferred_element_type=jnp.float32)
        + b_ref[...]
    )  # (T_CHUNK*BLOCK_B, 4H) f32, gate order i, f, o, g

    # Loop-invariant loads & validity masks hoisted off the serial chain.
    whh = whh_ref[...]                                   # (H, 4H) bf16
    lens = lens_ref[...]                                 # (BLOCK_B, 1) int32
    steps = t_blk * T_CHUNK + jax.lax.broadcasted_iota(
        jnp.int32, (T_CHUNK, BLOCK_B, 1), 0)
    valid_all = steps < lens[None, :, :]                 # (T_CHUNK, BLOCK_B, 1)

    # LSTM state lives in vregs inside the chunk (scratch only between chunks).
    h = h_ref[...]
    c = c_ref[...]

    # --- Fully unrolled static recurrence over the chunk so the LLO scheduler
    # can interleave EUP/VPU/MXU work across steps.
    for s in range(T_CHUNK):
        gates = gx[s * BLOCK_B:(s + 1) * BLOCK_B, :] + jnp.dot(
            h.astype(jnp.bfloat16), whh, preferred_element_type=jnp.float32
        )  # (BLOCK_B, 4H) f32
        # Gate layout (i, f, o, g): one sigmoid over 3H lanes, one tanh over H.
        sig = jax.nn.sigmoid(gates[:, :3 * H])
        g_g = jnp.tanh(gates[:, 3 * H:])
        i_g = sig[:, 0:H]
        f_g = sig[:, H:2 * H]
        o_g = sig[:, 2 * H:3 * H]
        c_new = f_g * c + i_g * g_g
        h_new = o_g * jnp.tanh(c_new)
        # pack_padded_sequence semantics: padded timesteps never update state,
        # so the final h equals h at the last valid timestep.
        valid = valid_all[s]                             # (BLOCK_B, 1)
        h = jnp.where(valid, h_new, h)
        c = jnp.where(valid, c_new, c)

    h_ref[...] = h
    c_ref[...] = c

    # --- Prediction head after the last time chunk (lane-dense 128-lane store).
    @pl.when(t_blk == n_t - 1)
    def _():
        z = jnp.maximum(
            jnp.dot(h.astype(jnp.bfloat16), w1_ref[...],
                    preferred_element_type=jnp.float32) + b1_ref[...],
            0.0,
        )
        out_ref[...] = (
            jnp.dot(z.astype(jnp.bfloat16), w2_ref[...],
                    preferred_element_type=jnp.float32) + b2_ref[...]
        )


def summary_prediction_forward(x_tbd, lengths, params, *, max_len=None,
                               block_b=128, t_chunk=32):
    """x_tbd: (T, B, D_in) f32 time-major, lengths: (B,) int32.

    max_len (optional, static python int): upper bound on the valid lengths.
    Timesteps >= max_len are skipped entirely (never DMA'd or computed);
    caller must guarantee max_len >= max(lengths) or they are truncated.
    For large workloads, batch many independent sequences into one call so the
    batch block fills the MXU rows (block_b defaults to 128).
    """
    T, B, D = x_tbd.shape
    H = params["whh"].shape[0]
    H2 = params["w1"].shape[1]
    OUT = params["w2"].shape[1]

    SUBLANE, LANE = 8, 128

    def round_up(a, m):
        return ((a + m - 1) // m) * m

    # --- batch padding / blocking (parallel grid axis; shards over v7x TCs).
    Bp8 = max(SUBLANE, round_up(B, SUBLANE))
    BLOCK_B = min(int(block_b), Bp8)
    Bp = round_up(Bp8, BLOCK_B)
    nb = Bp // BLOCK_B

    # --- time blocking (arbitrary grid axis; pipelined x DMA), optionally
    # trimmed to the longest valid length so padded tail steps cost nothing.
    T_eff = T if max_len is None else max(1, min(int(max_len), T))
    T_CHUNK = min(int(t_chunk), T_eff)
    nt = pl.cdiv(T_eff, T_CHUNK)
    T_pad = nt * T_CHUNK

    OUTp = max(LANE, round_up(OUT, LANE))

    x_p = jnp.zeros((T_pad, Bp, D), jnp.float32)
    x_p = x_p.at[:T_eff, :B, :].set(x_tbd[:T_eff].astype(jnp.float32))
    # Padded batch rows get length 0 -> state stays zero; sliced away below.
    lens_p = jnp.zeros((Bp, 1), jnp.int32).at[:B, 0].set(
        lengths.astype(jnp.int32))

    # bf16 MXU operands (f32 accumulate inside the kernel); biases stay f32.
    wih = params["wih"].astype(jnp.bfloat16)                      # (D, 4H)
    whh = params["whh"].astype(jnp.bfloat16)                      # (H, 4H)
    w1 = params["w1"].astype(jnp.bfloat16)                        # (H, H2)
    w2 = jnp.pad(params["w2"],
                 ((0, 0), (0, OUTp - OUT))).astype(jnp.bfloat16)  # (H2, OUTp)
    b = params["b"].astype(jnp.float32)                           # (1, 4H)
    b1 = params["b1"].astype(jnp.float32)                         # (1, H2)
    b2 = jnp.pad(params["b2"],
                 ((0, 0), (0, OUTp - OUT))).astype(jnp.float32)   # (1, OUTp)

    flops = int(
        2 * T_pad * Bp * (D + H) * 4 * H        # input + recurrent projections
        + 2 * Bp * (H * H2 + H2 * OUTp)         # MLP head
    )
    transcendentals = int(5 * T_pad * Bp * H)   # sigmoid(3H)+tanh(H)+tanh(H)/step
    bytes_accessed = int(
        4 * (x_p.size + lens_p.size + b.size + b1.size + b2.size + Bp * OUTp)
        + 2 * (wih.size + whh.size + w1.size + w2.size)
    )

    const = lambda b_, t_: (0, 0)  # weights: single block, DMA'd once

    out_p = pl.pallas_call(
        _lstm_mlp_kernel,
        out_shape=jax.ShapeDtypeStruct((Bp, OUTp), jnp.float32),
        grid=(nb, nt),
        in_specs=[
            pl.BlockSpec((T_CHUNK, BLOCK_B, D), lambda b_, t_: (t_, b_, 0)),
            pl.BlockSpec((BLOCK_B, 1), lambda b_, t_: (b_, 0)),
            pl.BlockSpec((D, 4 * H), const),
            pl.BlockSpec((H, 4 * H), const),
            pl.BlockSpec((1, 4 * H), const),
            pl.BlockSpec((H, H2), const),
            pl.BlockSpec((1, H2), const),
            pl.BlockSpec((H2, OUTp), const),
            pl.BlockSpec((1, OUTp), const),
        ],
        out_specs=pl.BlockSpec((BLOCK_B, OUTp), lambda b_, t_: (b_, 0)),
        scratch_shapes=[
            pltpu.VMEM((BLOCK_B, H), jnp.float32),   # h carry across time chunks
            pltpu.VMEM((BLOCK_B, H), jnp.float32),   # c carry across time chunks
        ],
        compiler_params=pltpu.CompilerParams(
            dimension_semantics=("parallel", "arbitrary")),
        cost_estimate=pl.CostEstimate(
            flops=flops,
            transcendentals=transcendentals,
            bytes_accessed=bytes_accessed,
        ),
    )(x_p, lens_p, wih, whh, b, w1, b1, w2, b2)
    # TODO(synk): for fully dynamic lengths under jit, prefetch max(lengths)
    # via PrefetchScalarGridSpec(num_scalar_prefetch=1) and bound the time
    # grid in-kernel instead of the static max_len argument.
    return out_p[:B, :OUT]


def reference_forward(x_tbd, lengths, params, matmul_dtype=jnp.float32):
    """Pure-JAX reference (mirrors PyTorch packed LSTM + MLP head).

    `matmul_dtype=jnp.bfloat16` reproduces the kernel's mixed-precision MXU
    configuration (bf16 operands, f32 accumulation, f32 element-wise)."""
    T, B, D = x_tbd.shape
    H = params["whh"].shape[0]

    def mm(a, w):
        return jnp.dot(a.astype(matmul_dtype), w.astype(matmul_dtype),
                       preferred_element_type=jnp.float32)

    h = jnp.zeros((B, H), jnp.float32)
    c = jnp.zeros((B, H), jnp.float32)
    lens = lengths.reshape(B, 1)
    for t in range(T):
        gates = mm(x_tbd[t], params["wih"]) + mm(h, params["whh"]) + params["b"]
        sig = jax.nn.sigmoid(gates[:, :3 * H])
        g_g = jnp.tanh(gates[:, 3 * H:])
        i_g = sig[:, 0:H]
        f_g = sig[:, H:2 * H]
        o_g = sig[:, 2 * H:3 * H]
        c_new = f_g * c + i_g * g_g
        h_new = o_g * jnp.tanh(c_new)
        valid = t < lens
        h = jnp.where(valid, h_new, h)
        c = jnp.where(valid, c_new, c)
    z = jnp.maximum(mm(h, params["w1"]) + params["b1"], 0.0)
    return mm(z, params["w2"]) + params["b2"]


def make_params(key, d_in, hidden, mlp_hidden, out_dim):
    ks = jax.random.split(key, 8)
    scale = 0.2
    # PyTorch LSTM param shapes: weight_ih (4H, D), weight_hh (4H, H),
    # bias_ih / bias_hh (4H,), gate order (i, f, g, o) along 4H.
    wih = scale * jax.random.normal(ks[0], (4 * hidden, d_in), jnp.float32)
    whh = scale * jax.random.normal(ks[1], (4 * hidden, hidden), jnp.float32)
    b_ih = scale * jax.random.normal(ks[2], (4 * hidden,), jnp.float32)
    b_hh = scale * jax.random.normal(ks[3], (4 * hidden,), jnp.float32)
    w1 = scale * jax.random.normal(ks[4], (mlp_hidden, hidden), jnp.float32)
    b1 = scale * jax.random.normal(ks[5], (mlp_hidden,), jnp.float32)
    w2 = scale * jax.random.normal(ks[6], (out_dim, mlp_hidden), jnp.float32)
    b2 = scale * jax.random.normal(ks[7], (out_dim,), jnp.float32)
    # Reorder gates from PyTorch (i,f,g,o) to (i,f,o,g) so the kernel applies
    # a single sigmoid over the contiguous first 3H lanes and a single tanh
    # over the last H lanes (2 EUP pushes per step instead of 4).
    perm = jnp.concatenate([
        jnp.arange(0, 2 * hidden),
        jnp.arange(3 * hidden, 4 * hidden),
        jnp.arange(2 * hidden, 3 * hidden),
    ])
    return {
        "wih": wih.T[:, perm],                        # (D, 4H)
        "whh": whh.T[:, perm],                        # (H, 4H)
        "b": (b_ih + b_hh)[perm].reshape(1, -1),      # (1, 4H)
        "w1": w1.T,                                   # (H, H2)
        "b1": b1.reshape(1, -1),                      # (1, H2)
        "w2": w2.T,                                   # (H2, OUT)
        "b2": b2.reshape(1, -1),                      # (1, OUT)
    }


if __name__ == "__main__":
    # Small shapes: batch=2, seq=8, input_dim=8, hidden=32, mlp_hidden=32, out=4.
    B, T, D_IN, H, H2, OUT = 2, 8, 8, 32, 32, 4

    key = jax.random.PRNGKey(0)
    k_x, k_p = jax.random.split(key)

    # Past sequence (time-major for the kernel) and per-sequence valid lengths
    # (what pack_padded_sequence would carry; sequences are right-padded).
    x_tbd = jax.random.normal(k_x, (T, B, D_IN), jnp.float32)
    lengths = jnp.array([T, T - 3], dtype=jnp.int32)

    params = make_params(k_p, D_IN, H, H2, OUT)

    out = summary_prediction_forward(
        x_tbd, lengths, params, max_len=int(lengths.max()))
    out = jax.block_until_ready(out)

    ref_mx = reference_forward(x_tbd, lengths, params,
                               matmul_dtype=jnp.bfloat16)  # kernel precision
    ref_f32 = reference_forward(x_tbd, lengths, params,
                                matmul_dtype=jnp.float32)  # module precision
    assert out.shape == (B, OUT)
    assert jnp.allclose(out, ref_mx, atol=2e-3, rtol=2e-3), \
        "mismatch vs bf16-MXU reference"
    assert jnp.allclose(out, ref_f32, atol=5e-2, rtol=5e-2), \
        "mismatch vs f32 reference"

    # TODO(synk): loss_criterion (NaN/Inf-masked MSE) is training-only glue and
    # is not part of the forward pass, so it is not implemented as a kernel.
    print("KERNEL_OK")
</pallas_src>

<mosaic_0001>
module attributes {stable_mosaic.version = 11 : i64} {
  func.func @_lstm_mlp_kernel(%arg0: i32, %arg1: i32, %arg2: memref<8x8x8xf32, #tpu.memory_space<vmem>>, %arg3: memref<8x1xi32, #tpu.memory_space<vmem>>, %arg4: memref<8x128xbf16, #tpu.memory_space<vmem>>, %arg5: memref<32x128xbf16, #tpu.memory_space<vmem>>, %arg6: memref<1x128xf32, #tpu.memory_space<vmem>>, %arg7: memref<32x32xbf16, #tpu.memory_space<vmem>>, %arg8: memref<1x32xf32, #tpu.memory_space<vmem>>, %arg9: memref<32x128xbf16, #tpu.memory_space<vmem>>, %arg10: memref<1x128xf32, #tpu.memory_space<vmem>>, %arg11: memref<8x128xf32, #tpu.memory_space<vmem>>, %arg12: memref<8x32xf32, #tpu.memory_space<vmem>>, %arg13: memref<8x32xf32, #tpu.memory_space<vmem>>) attributes {dimension_semantics = [#tpu.dimension_semantics<parallel>, #tpu.dimension_semantics<arbitrary>], iteration_bounds = array<i64: 1, 1>, scalar_prefetch = 0 : i64, scratch_operands = 2 : i64, tpu.core_type = #tpu.core_type<tc>, window_params = [{transform_indices = @transform_0, window_bounds = array<i64: 8, 8, 8>}, {transform_indices = @transform_1, window_bounds = array<i64: 8, 1>}, {pipeline_mode = #tpu.pipeline_mode<synchronous>, transform_indices = @transform_2, window_bounds = array<i64: 8, 128>}, {pipeline_mode = #tpu.pipeline_mode<synchronous>, transform_indices = @transform_3, window_bounds = array<i64: 32, 128>}, {pipeline_mode = #tpu.pipeline_mode<synchronous>, transform_indices = @transform_4, window_bounds = array<i64: 1, 128>}, {pipeline_mode = #tpu.pipeline_mode<synchronous>, transform_indices = @transform_5, window_bounds = array<i64: 32, 32>}, {pipeline_mode = #tpu.pipeline_mode<synchronous>, transform_indices = @transform_6, window_bounds = array<i64: 1, 32>}, {pipeline_mode = #tpu.pipeline_mode<synchronous>, transform_indices = @transform_7, window_bounds = array<i64: 32, 128>}, {pipeline_mode = #tpu.pipeline_mode<synchronous>, transform_indices = @transform_8, window_bounds = array<i64: 1, 128>}, {transform_indices = @transform_9, window_bounds = array<i64: 8, 128>}]} {
    %c0_i32 = arith.constant 0 : i32
    %0 = arith.cmpi eq, %arg1, %c0_i32 : i32
    %1 = arith.extui %0 : i1 to i32
    %c0_i32_0 = arith.constant 0 : i32
    %2 = arith.cmpi ne, %1, %c0_i32_0 : i32
    scf.if %2 {
      %cst_37 = arith.constant 0.000000e+00 : f32
      %251 = vector.broadcast %cst_37 : f32 to vector<8x32xf32>
      %c0_38 = arith.constant 0 : index
      %c0_39 = arith.constant 0 : index
      %252 = vector.load %arg12[%c0_38, %c0_39] : memref<8x32xf32, #tpu.memory_space<vmem>>, vector<8x32xf32>
      tpu.vector_store %arg12[%c0_38, %c0_39], %251 {strides = array<i32>} : memref<8x32xf32, #tpu.memory_space<vmem>>, vector<8x32xf32>,
      %cst_40 = arith.constant 0.000000e+00 : f32
      %253 = vector.broadcast %cst_40 : f32 to vector<8x32xf32>
      %c0_41 = arith.constant 0 : index
      %c0_42 = arith.constant 0 : index
      %254 = vector.load %arg13[%c0_41, %c0_42] : memref<8x32xf32, #tpu.memory_space<vmem>>, vector<8x32xf32>
      tpu.vector_store %arg13[%c0_41, %c0_42], %253 {strides = array<i32>} : memref<8x32xf32, #tpu.memory_space<vmem>>, vector<8x32xf32>,
    } else {
    }
    %c0 = arith.constant 0 : index
    %c0_1 = arith.constant 0 : index
    %c0_2 = arith.constant 0 : index
    %3 = vector.load %arg2[%c0, %c0_1, %c0_2] : memref<8x8x8xf32, #tpu.memory_space<vmem>>, vector<8x8x8xf32>
    %4 = vector.shape_cast %3 : vector<8x8x8xf32> to vector<64x8xf32>
    %5 = arith.truncf %4 : vector<64x8xf32> to vector<64x8xbf16>
    %c0_3 = arith.constant 0 : index
    %c0_4 = arith.constant 0 : index
    %6 = vector.load %arg4[%c0_3, %c0_4] : memref<8x128xbf16, #tpu.memory_space<vmem>>, vector<8x128xbf16>
    %cst = arith.constant dense<0.000000e+00> : vector<64x128xf32>
    %7 = tpu.matmul %5, %6, %cst {dimension_numbers = #tpu.dot_dimension_numbers<[1], [0], [0], [1], [0, 0, 1, 1], [], []>} : vector<64x8xbf16>, vector<8x128xbf16>, vector<64x128xf32> -> vector<64x128xf32>
    %c0_5 = arith.constant 0 : index
    %c0_6 = arith.constant 0 : index
    %8 = vector.load %arg6[%c0_5, %c0_6] : memref<1x128xf32, #tpu.memory_space<vmem>>, vector<1x128xf32>
    %9 = vector.broadcast %8 : vector<1x128xf32> to vector<64x128xf32>
    %10 = arith.addf %7, %9 : vector<64x128xf32>
    %c0_7 = arith.constant 0 : index
    %c0_8 = arith.constant 0 : index
    %11 = vector.load %arg5[%c0_7, %c0_8] : memref<32x128xbf16, #tpu.memory_space<vmem>>, vector<32x128xbf16>
    %c0_9 = arith.constant 0 : index
    %c0_10 = arith.constant 0 : index
    %12 = vector.load %arg3[%c0_9, %c0_10] : memref<8x1xi32, #tpu.memory_space<vmem>>, vector<8x1xi32>
    %c8_i32 = arith.constant 8 : i32
    %13 = arith.muli %arg1, %c8_i32 : i32
    %14 = tpu.iota {dimensions = array<i32: 0>} : vector<8x8x1xi32>
    %15 = vector.broadcast %13 : i32 to vector<8x8x1xi32>
    %16 = arith.addi %15, %14 : vector<8x8x1xi32>
    %17 = vector.shape_cast %12 : vector<8x1xi32> to vector<1x8x1xi32>
    %18 = vector.broadcast %17 : vector<1x8x1xi32> to vector<8x8x1xi32>
    %19 = arith.cmpi slt, %16, %18 : vector<8x8x1xi32>
    %c0_11 = arith.constant 0 : index
    %c0_12 = arith.constant 0 : index
    %20 = vector.load %arg12[%c0_11, %c0_12] : memref<8x32xf32, #tpu.memory_space<vmem>>, vector<8x32xf32>
    %c0_13 = arith.constant 0 : index
    %c0_14 = arith.constant 0 : index
    %21 = vector.load %arg13[%c0_13, %c0_14] : memref<8x32xf32, #tpu.memory_space<vmem>>, vector<8x32xf32>
    %22 = vector.extract_strided_slice %10 {offsets = [0, 0], sizes = [8, 128], strides = [1, 1]} : vector<64x128xf32> to vector<8x128xf32>
    %23 = arith.truncf %20 : vector<8x32xf32> to vector<8x32xbf16>
    %cst_15 = arith.constant dense<0.000000e+00> : vector<8x128xf32>
    %24 = tpu.matmul %23, %11, %cst_15 {dimension_numbers = #tpu.dot_dimension_numbers<[1], [0], [0], [1], [0, 0, 1, 1], [], []>} : vector<8x32xbf16>, vector<32x128xbf16>, vector<8x128xf32> -> vector<8x128xf32>
    %25 = arith.addf %22, %24 : vector<8x128xf32>
    %26 = vector.extract_strided_slice %25 {offsets = [0, 0], sizes = [8, 96], strides = [1, 1]} : vector<8x128xf32> to vector<8x96xf32>
    %27 = arith.negf %26 : vector<8x96xf32>
    %28 = math.exp %27 : vector<8x96xf32>
    %cst_16 = arith.constant 1.000000e+00 : f32
    %29 = vector.broadcast %cst_16 : f32 to vector<8x96xf32>
    %30 = arith.addf %29, %28 : vector<8x96xf32>
    %31 = arith.divf %29, %30 : vector<8x96xf32>
    %32 = vector.extract_strided_slice %25 {offsets = [0, 96], sizes = [8, 32], strides = [1, 1]} : vector<8x128xf32> to vector<8x32xf32>
    %33 = math.tanh %32 : vector<8x32xf32>
    %34 = vector.extract_strided_slice %31 {offsets = [0, 0], sizes = [8, 32], strides = [1, 1]} : vector<8x96xf32> to vector<8x32xf32>
    %35 = vector.extract_strided_slice %31 {offsets = [0, 32], sizes = [8, 32], strides = [1, 1]} : vector<8x96xf32> to vector<8x32xf32>
    %36 = vector.extract_strided_slice %31 {offsets = [0, 64], sizes = [8, 32], strides = [1, 1]} : vector<8x96xf32> to vector<8x32xf32>
    %37 = arith.mulf %35, %21 : vector<8x32xf32>
    %38 = arith.mulf %34, %33 : vector<8x32xf32>
    %39 = arith.addf %37, %38 : vector<8x32xf32>
    %40 = math.tanh %39 : vector<8x32xf32>
    %41 = arith.mulf %36, %40 : vector<8x32xf32>
    %42 = vector.extract_strided_slice %19 {offsets = [0, 0, 0], sizes = [1, 8, 1], strides = [1, 1, 1]} : vector<8x8x1xi1> to vector<1x8x1xi1>
    %43 = vector.shape_cast %42 : vector<1x8x1xi1> to vector<8x1xi1>
    %44 = vector.shape_cast %43 : vector<8x1xi1> to vector<8x1xi1>
    %45 = vector.broadcast %44 : vector<8x1xi1> to vector<8x32xi1>
    %46 = arith.select %45, %41, %20 : vector<8x32xi1>, vector<8x32xf32>
    %47 = vector.shape_cast %43 : vector<8x1xi1> to vector<8x1xi1>
    %48 = vector.broadcast %47 : vector<8x1xi1> to vector<8x32xi1>
    %49 = arith.select %48, %39, %21 : vector<8x32xi1>, vector<8x32xf32>
    %50 = vector.extract_strided_slice %10 {offsets = [8, 0], sizes = [8, 128], strides = [1, 1]} : vector<64x128xf32> to vector<8x128xf32>
    %51 = arith.truncf %46 : vector<8x32xf32> to vector<8x32xbf16>
    %cst_17 = arith.constant dense<0.000000e+00> : vector<8x128xf32>
    %52 = tpu.matmul %51, %11, %cst_17 {dimension_numbers = #tpu.dot_dimension_numbers<[1], [0], [0], [1], [0, 0, 1, 1], [], []>} : vector<8x32xbf16>, vector<32x128xbf16>, vector<8x128xf32> -> vector<8x128xf32>
    %53 = arith.addf %50, %52 : vector<8x128xf32>
    %54 = vector.extract_strided_slice %53 {offsets = [0, 0], sizes = [8, 96], strides = [1, 1]} : vector<8x128xf32> to vector<8x96xf32>
    %55 = arith.negf %54 : vector<8x96xf32>
    %56 = math.exp %55 : vector<8x96xf32>
    %cst_18 = arith.constant 1.000000e+00 : f32
    %57 = vector.broadcast %cst_18 : f32 to vector<8x96xf32>
    %58 = arith.addf %57, %56 : vector<8x96xf32>
    %59 = arith.divf %57, %58 : vector<8x96xf32>
    %60 = vector.extract_strided_slice %53 {offsets = [0, 96], sizes = [8, 32], strides = [1, 1]} : vector<8x128xf32> to vector<8x32xf32>
    %61 = math.tanh %60 : vector<8x32xf32>
    %62 = vector.extract_strided_slice %59 {offsets = [0, 0], sizes = [8, 32], strides = [1, 1]} : vector<8x96xf32> to vector<8x32xf32>
    %63 = vector.extract_strided_slice %59 {offsets = [0, 32], sizes = [8, 32], strides = [1, 1]} : vector<8x96xf32> to vector<8x32xf32>
    %64 = vector.extract_strided_slice %59 {offsets = [0, 64], sizes = [8, 32], strides = [1, 1]} : vector<8x96xf32> to vector<8x32xf32>
    %65 = arith.mulf %63, %49 : vector<8x32xf32>
    %66 = arith.mulf %62, %61 : vector<8x32xf32>
    %67 = arith.addf %65, %66 : vector<8x32xf32>
    %68 = math.tanh %67 : vector<8x32xf32>
    %69 = arith.mulf %64, %68 : vector<8x32xf32>
    %70 = vector.extract_strided_slice %19 {offsets = [1, 0, 0], sizes = [1, 8, 1], strides = [1, 1, 1]} : vector<8x8x1xi1> to vector<1x8x1xi1>
    %71 = vector.shape_cast %70 : vector<1x8x1xi1> to vector<8x1xi1>
    %72 = vector.shape_cast %71 : vector<8x1xi1> to vector<8x1xi1>
    %73 = vector.broadcast %72 : vector<8x1xi1> to vector<8x32xi1>
    %74 = arith.select %73, %69, %46 : vector<8x32xi1>, vector<8x32xf32>
    %75 = vector.shape_cast %71 : vector<8x1xi1> to vector<8x1xi1>
    %76 = vector.broadcast %75 : vector<8x1xi1> to vector<8x32xi1>
    %77 = arith.select %76, %67, %49 : vector<8x32xi1>, vector<8x32xf32>
    %78 = vector.extract_strided_slice %10 {offsets = [16, 0], sizes = [8, 128], strides = [1, 1]} : vector<64x128xf32> to vector<8x128xf32>
    %79 = arith.truncf %74 : vector<8x32xf32> to vector<8x32xbf16>
    %cst_19 = arith.constant dense<0.000000e+00> : vector<8x128xf32>
    %80 = tpu.matmul %79, %11, %cst_19 {dimension_numbers = #tpu.dot_dimension_numbers<[1], [0], [0], [1], [0, 0, 1, 1], [], []>} : vector<8x32xbf16>, vector<32x128xbf16>, vector<8x128xf32> -> vector<8x128xf32>
    %81 = arith.addf %78, %80 : vector<8x128xf32>
    %82 = vector.extract_strided_slice %81 {offsets = [0, 0], sizes = [8, 96], strides = [1, 1]} : vector<8x128xf32> to vector<8x96xf32>
    %83 = arith.negf %82 : vector<8x96xf32>
    %84 = math.exp %83 : vector<8x96xf32>
    %cst_20 = arith.constant 1.000000e+00 : f32
    %85 = vector.broadcast %cst_20 : f32 to vector<8x96xf32>
    %86 = arith.addf %85, %84 : vector<8x96xf32>
    %87 = arith.divf %85, %86 : vector<8x96xf32>
    %88 = vector.extract_strided_slice %81 {offsets = [0, 96], sizes = [8, 32], strides = [1, 1]} : vector<8x128xf32> to vector<8x32xf32>
    %89 = math.tanh %88 : vector<8x32xf32>
    %90 = vector.extract_strided_slice %87 {offsets = [0, 0], sizes = [8, 32], strides = [1, 1]} : vector<8x96xf32> to vector<8x32xf32>
    %91 = vector.extract_strided_slice %87 {offsets = [0, 32], sizes = [8, 32], strides = [1, 1]} : vector<8x96xf32> to vector<8x32xf32>
    %92 = vector.extract_strided_slice %87 {offsets = [0, 64], sizes = [8, 32], strides = [1, 1]} : vector<8x96xf32> to vector<8x32xf32>
    %93 = arith.mulf %91, %77 : vector<8x32xf32>
    %94 = arith.mulf %90, %89 : vector<8x32xf32>
    %95 = arith.addf %93, %94 : vector<8x32xf32>
    %96 = math.tanh %95 : vector<8x32xf32>
    %97 = arith.mulf %92, %96 : vector<8x32xf32>
    %98 = vector.extract_strided_slice %19 {offsets = [2, 0, 0], sizes = [1, 8, 1], strides = [1, 1, 1]} : vector<8x8x1xi1> to vector<1x8x1xi1>
    %99 = vector.shape_cast %98 : vector<1x8x1xi1> to vector<8x1xi1>
    %100 = vector.shape_cast %99 : vector<8x1xi1> to vector<8x1xi1>
    %101 = vector.broadcast %100 : vector<8x1xi1> to vector<8x32xi1>
    %102 = arith.select %101, %97, %74 : vector<8x32xi1>, vector<8x32xf32>
    %103 = vector.shape_cast %99 : vector<8x1xi1> to vector<8x1xi1>
    %104 = vector.broadcast %103 : vector<8x1xi1> to vector<8x32xi1>
    %105 = arith.select %104, %95, %77 : vector<8x32xi1>, vector<8x32xf32>
    %106 = vector.extract_strided_slice %10 {offsets = [24, 0], sizes = [8, 128], strides = [1, 1]} : vector<64x128xf32> to vector<8x128xf32>
    %107 = arith.truncf %102 : vector<8x32xf32> to vector<8x32xbf16>
    %cst_21 = arith.constant dense<0.000000e+00> : vector<8x128xf32>
    %108 = tpu.matmul %107, %11, %cst_21 {dimension_numbers = #tpu.dot_dimension_numbers<[1], [0], [0], [1], [0, 0, 1, 1], [], []>} : vector<8x32xbf16>, vector<32x128xbf16>, vector<8x128xf32> -> vector<8x128xf32>
    %109 = arith.addf %106, %108 : vector<8x128xf32>
    %110 = vector.extract_strided_slice %109 {offsets = [0, 0], sizes = [8, 96], strides = [1, 1]} : vector<8x128xf32> to vector<8x96xf32>
    %111 = arith.negf %110 : vector<8x96xf32>
    %112 = math.exp %111 : vector<8x96xf32>
    %cst_22 = arith.constant 1.000000e+00 : f32
    %113 = vector.broadcast %cst_22 : f32 to vector<8x96xf32>
    %114 = arith.addf %113, %112 : vector<8x96xf32>
    %115 = arith.divf %113, %114 : vector<8x96xf32>
    %116 = vector.extract_strided_slice %109 {offsets = [0, 96], sizes = [8, 32], strides = [1, 1]} : vector<8x128xf32> to vector<8x32xf32>
    %117 = math.tanh %116 : vector<8x32xf32>
    %118 = vector.extract_strided_slice %115 {offsets = [0, 0], sizes = [8, 32], strides = [1, 1]} : vector<8x96xf32> to vector<8x32xf32>
    %119 = vector.extract_strided_slice %115 {offsets = [0, 32], sizes = [8, 32], strides = [1, 1]} : vector<8x96xf32> to vector<8x32xf32>
    %120 = vector.extract_strided_slice %115 {offsets = [0, 64], sizes = [8, 32], strides = [1, 1]} : vector<8x96xf32> to vector<8x32xf32>
    %121 = arith.mulf %119, %105 : vector<8x32xf32>
    %122 = arith.mulf %118, %117 : vector<8x32xf32>
    %123 = arith.addf %121, %122 : vector<8x32xf32>
    %124 = math.tanh %123 : vector<8x32xf32>
    %125 = arith.mulf %120, %124 : vector<8x32xf32>
    %126 = vector.extract_strided_slice %19 {offsets = [3, 0, 0], sizes = [1, 8, 1], strides = [1, 1, 1]} : vector<8x8x1xi1> to vector<1x8x1xi1>
    %127 = vector.shape_cast %126 : vector<1x8x1xi1> to vector<8x1xi1>
    %128 = vector.shape_cast %127 : vector<8x1xi1> to vector<8x1xi1>
    %129 = vector.broadcast %128 : vector<8x1xi1> to vector<8x32xi1>
    %130 = arith.select %129, %125, %102 : vector<8x32xi1>, vector<8x32xf32>
    %131 = vector.shape_cast %127 : vector<8x1xi1> to vector<8x1xi1>
    %132 = vector.broadcast %131 : vector<8x1xi1> to vector<8x32xi1>
    %133 = arith.select %132, %123, %105 : vector<8x32xi1>, vector<8x32xf32>
    %134 = vector.extract_strided_slice %10 {offsets = [32, 0], sizes = [8, 128], strides = [1, 1]} : vector<64x128xf32> to vector<8x128xf32>
    %135 = arith.truncf %130 : vector<8x32xf32> to vector<8x32xbf16>
    %cst_23 = arith.constant dense<0.000000e+00> : vector<8x128xf32>
    %136 = tpu.matmul %135, %11, %cst_23 {dimension_numbers = #tpu.dot_dimension_numbers<[1], [0], [0], [1], [0, 0, 1, 1], [], []>} : vector<8x32xbf16>, vector<32x128xbf16>, vector<8x128xf32> -> vector<8x128xf32>
    %137 = arith.addf %134, %136 : vector<8x128xf32>
    %138 = vector.extract_strided_slice %137 {offsets = [0, 0], sizes = [8, 96], strides = [1, 1]} : vector<8x128xf32> to vector<8x96xf32>
    %139 = arith.negf %138 : vector<8x96xf32>
    %140 = math.exp %139 : vector<8x96xf32>
    %cst_24 = arith.constant 1.000000e+00 : f32
    %141 = vector.broadcast %cst_24 : f32 to vector<8x96xf32>
    %142 = arith.addf %141, %140 : vector<8x96xf32>
    %143 = arith.divf %141, %142 : vector<8x96xf32>
    %144 = vector.extract_strided_slice %137 {offsets = [0, 96], sizes = [8, 32], strides = [1, 1]} : vector<8x128xf32> to vector<8x32xf32>
    %145 = math.tanh %144 : vector<8x32xf32>
    %146 = vector.extract_strided_slice %143 {offsets = [0, 0], sizes = [8, 32], strides = [1, 1]} : vector<8x96xf32> to vector<8x32xf32>
    %147 = vector.extract_strided_slice %143 {offsets = [0, 32], sizes = [8, 32], strides = [1, 1]} : vector<8x96xf32> to vector<8x32xf32>
    %148 = vector.extract_strided_slice %143 {offsets = [0, 64], sizes = [8, 32], strides = [1, 1]} : vector<8x96xf32> to vector<8x32xf32>
    %149 = arith.mulf %147, %133 : vector<8x32xf32>
    %150 = arith.mulf %146, %145 : vector<8x32xf32>
    %151 = arith.addf %149, %150 : vector<8x32xf32>
    %152 = math.tanh %151 : vector<8x32xf32>
    %153 = arith.mulf %148, %152 : vector<8x32xf32>
    %154 = vector.extract_strided_slice %19 {offsets = [4, 0, 0], sizes = [1, 8, 1], strides = [1, 1, 1]} : vector<8x8x1xi1> to vector<1x8x1xi1>
    %155 = vector.shape_cast %154 : vector<1x8x1xi1> to vector<8x1xi1>
    %156 = vector.shape_cast %155 : vector<8x1xi1> to vector<8x1xi1>
    %157 = vector.broadcast %156 : vector<8x1xi1> to vector<8x32xi1>
    %158 = arith.select %157, %153, %130 : vector<8x32xi1>, vector<8x32xf32>
    %159 = vector.shape_cast %155 : vector<8x1xi1> to vector<8x1xi1>
    %160 = vector.broadcast %159 : vector<8x1xi1> to vector<8x32xi1>
    %161 = arith.select %160, %151, %133 : vector<8x32xi1>, vector<8x32xf32>
    %162 = vector.extract_strided_slice %10 {offsets = [40, 0], sizes = [8, 128], strides = [1, 1]} : vector<64x128xf32> to vector<8x128xf32>
    %163 = arith.truncf %158 : vector<8x32xf32> to vector<8x32xbf16>
    %cst_25 = arith.constant dense<0.000000e+00> : vector<8x128xf32>
    %164 = tpu.matmul %163, %11, %cst_25 {dimension_numbers = #tpu.dot_dimension_numbers<[1], [0], [0], [1], [0, 0, 1, 1], [], []>} : vector<8x32xbf16>, vector<32x128xbf16>, vector<8x128xf32> -> vector<8x128xf32>
    %165 = arith.addf %162, %164 : vector<8x128xf32>
    %166 = vector.extract_strided_slice %165 {offsets = [0, 0], sizes = [8, 96], strides = [1, 1]} : vector<8x128xf32> to vector<8x96xf32>
    %167 = arith.negf %166 : vector<8x96xf32>
    %168 = math.exp %167 : vector<8x96xf32>
    %cst_26 = arith.constant 1.000000e+00 : f32
    %169 = vector.broadcast %cst_26 : f32 to vector<8x96xf32>
    %170 = arith.addf %169, %168 : vector<8x96xf32>
    %171 = arith.divf %169, %170 : vector<8x96xf32>
    %172 = vector.extract_strided_slice %165 {offsets = [0, 96], sizes = [8, 32], strides = [1, 1]} : vector<8x128xf32> to vector<8x32xf32>
    %173 = math.tanh %172 : vector<8x32xf32>
    %174 = vector.extract_strided_slice %171 {offsets = [0, 0], sizes = [8, 32], strides = [1, 1]} : vector<8x96xf32> to vector<8x32xf32>
    %175 = vector.extract_strided_slice %171 {offsets = [0, 32], sizes = [8, 32], strides = [1, 1]} : vector<8x96xf32> to vector<8x32xf32>
    %176 = vector.extract_strided_slice %171 {offsets = [0, 64], sizes = [8, 32], strides = [1, 1]} : vector<8x96xf32> to vector<8x32xf32>
    %177 = arith.mulf %175, %161 : vector<8x32xf32>
    %178 = arith.mulf %174, %173 : vector<8x32xf32>
    %179 = arith.addf %177, %178 : vector<8x32xf32>
    %180 = math.tanh %179 : vector<8x32xf32>
    %181 = arith.mulf %176, %180 : vector<8x32xf32>
    %182 = vector.extract_strided_slice %19 {offsets = [5, 0, 0], sizes = [1, 8, 1], strides = [1, 1, 1]} : vector<8x8x1xi1> to vector<1x8x1xi1>
    %183 = vector.shape_cast %182 : vector<1x8x1xi1> to vector<8x1xi1>
    %184 = vector.shape_cast %183 : vector<8x1xi1> to vector<8x1xi1>
    %185 = vector.broadcast %184 : vector<8x1xi1> to vector<8x32xi1>
    %186 = arith.select %185, %181, %158 : vector<8x32xi1>, vector<8x32xf32>
    %187 = vector.shape_cast %183 : vector<8x1xi1> to vector<8x1xi1>
    %188 = vector.broadcast %187 : vector<8x1xi1> to vector<8x32xi1>
    %189 = arith.select %188, %179, %161 : vector<8x32xi1>, vector<8x32xf32>
    %190 = vector.extract_strided_slice %10 {offsets = [48, 0], sizes = [8, 128], strides = [1, 1]} : vector<64x128xf32> to vector<8x128xf32>
    %191 = arith.truncf %186 : vector<8x32xf32> to vector<8x32xbf16>
    %cst_27 = arith.constant dense<0.000000e+00> : vector<8x128xf32>
    %192 = tpu.matmul %191, %11, %cst_27 {dimension_numbers = #tpu.dot_dimension_numbers<[1], [0], [0], [1], [0, 0, 1, 1], [], []>} : vector<8x32xbf16>, vector<32x128xbf16>, vector<8x128xf32> -> vector<8x128xf32>
    %193 = arith.addf %190, %192 : vector<8x128xf32>
    %194 = vector.extract_strided_slice %193 {offsets = [0, 0], sizes = [8, 96], strides = [1, 1]} : vector<8x128xf32> to vector<8x96xf32>
    %195 = arith.negf %194 : vector<8x96xf32>
    %196 = math.exp %195 : vector<8x96xf32>
    %cst_28 = arith.constant 1.000000e+00 : f32
    %197 = vector.broadcast %cst_28 : f32 to vector<8x96xf32>
    %198 = arith.addf %197, %196 : vector<8x96xf32>
    %199 = arith.divf %197, %198 : vector<8x96xf32>
    %200 = vector.extract_strided_slice %193 {offsets = [0, 96], sizes = [8, 32], strides = [1, 1]} : vector<8x128xf32> to vector<8x32xf32>
    %201 = math.tanh %200 : vector<8x32xf32>
    %202 = vector.extract_strided_slice %199 {offsets = [0, 0], sizes = [8, 32], strides = [1, 1]} : vector<8x96xf32> to vector<8x32xf32>
    %203 = vector.extract_strided_slice %199 {offsets = [0, 32], sizes = [8, 32], strides = [1, 1]} : vector<8x96xf32> to vector<8x32xf32>
    %204 = vector.extract_strided_slice %199 {offsets = [0, 64], sizes = [8, 32], strides = [1, 1]} : vector<8x96xf32> to vector<8x32xf32>
    %205 = arith.mulf %203, %189 : vector<8x32xf32>
    %206 = arith.mulf %202, %201 : vector<8x32xf32>
    %207 = arith.addf %205, %206 : vector<8x32xf32>
    %208 = math.tanh %207 : vector<8x32xf32>
    %209 = arith.mulf %204, %208 : vector<8x32xf32>
    %210 = vector.extract_strided_slice %19 {offsets = [6, 0, 0], sizes = [1, 8, 1], strides = [1, 1, 1]} : vector<8x8x1xi1> to vector<1x8x1xi1>
    %211 = vector.shape_cast %210 : vector<1x8x1xi1> to vector<8x1xi1>
    %212 = vector.shape_cast %211 : vector<8x1xi1> to vector<8x1xi1>
    %213 = vector.broadcast %212 : vector<8x1xi1> to vector<8x32xi1>
    %214 = arith.select %213, %209, %186 : vector<8x32xi1>, vector<8x32xf32>
    %215 = vector.shape_cast %211 : vector<8x1xi1> to vector<8x1xi1>
    %216 = vector.broadcast %215 : vector<8x1xi1> to vector<8x32xi1>
    %217 = arith.select %216, %207, %189 : vector<8x32xi1>, vector<8x32xf32>
    %218 = vector.extract_strided_slice %10 {offsets = [56, 0], sizes = [8, 128], strides = [1, 1]} : vector<64x128xf32> to vector<8x128xf32>
    %219 = arith.truncf %214 : vector<8x32xf32> to vector<8x32xbf16>
    %cst_29 = arith.constant dense<0.000000e+00> : vector<8x128xf32>
    %220 = tpu.matmul %219, %11, %cst_29 {dimension_numbers = #tpu.dot_dimension_numbers<[1], [0], [0], [1], [0, 0, 1, 1], [], []>} : vector<8x32xbf16>, vector<32x128xbf16>, vector<8x128xf32> -> vector<8x128xf32>
    %221 = arith.addf %218, %220 : vector<8x128xf32>
    %222 = vector.extract_strided_slice %221 {offsets = [0, 0], sizes = [8, 96], strides = [1, 1]} : vector<8x128xf32> to vector<8x96xf32>
    %223 = arith.negf %222 : vector<8x96xf32>
    %224 = math.exp %223 : vector<8x96xf32>
    %cst_30 = arith.constant 1.000000e+00 : f32
    %225 = vector.broadcast %cst_30 : f32 to vector<8x96xf32>
    %226 = arith.addf %225, %224 : vector<8x96xf32>
    %227 = arith.divf %225, %226 : vector<8x96xf32>
    %228 = vector.extract_strided_slice %221 {offsets = [0, 96], sizes = [8, 32], strides = [1, 1]} : vector<8x128xf32> to vector<8x32xf32>
    %229 = math.tanh %228 : vector<8x32xf32>
    %230 = vector.extract_strided_slice %227 {offsets = [0, 0], sizes = [8, 32], strides = [1, 1]} : vector<8x96xf32> to vector<8x32xf32>
    %231 = vector.extract_strided_slice %227 {offsets = [0, 32], sizes = [8, 32], strides = [1, 1]} : vector<8x96xf32> to vector<8x32xf32>
    %232 = vector.extract_strided_slice %227 {offsets = [0, 64], sizes = [8, 32], strides = [1, 1]} : vector<8x96xf32> to vector<8x32xf32>
    %233 = arith.mulf %231, %217 : vector<8x32xf32>
    %234 = arith.mulf %230, %229 : vector<8x32xf32>
    %235 = arith.addf %233, %234 : vector<8x32xf32>
    %236 = math.tanh %235 : vector<8x32xf32>
    %237 = arith.mulf %232, %236 : vector<8x32xf32>
    %238 = vector.extract_strided_slice %19 {offsets = [7, 0, 0], sizes = [1, 8, 1], strides = [1, 1, 1]} : vector<8x8x1xi1> to vector<1x8x1xi1>
    %239 = vector.shape_cast %238 : vector<1x8x1xi1> to vector<8x1xi1>
    %240 = vector.shape_cast %239 : vector<8x1xi1> to vector<8x1xi1>
    %241 = vector.broadcast %240 : vector<8x1xi1> to vector<8x32xi1>
    %242 = arith.select %241, %237, %214 : vector<8x32xi1>, vector<8x32xf32>
    %243 = vector.shape_cast %239 : vector<8x1xi1> to vector<8x1xi1>
    %244 = vector.broadcast %243 : vector<8x1xi1> to vector<8x32xi1>
    %245 = arith.select %244, %235, %217 : vector<8x32xi1>, vector<8x32xf32>
    %c0_31 = arith.constant 0 : index
    %c0_32 = arith.constant 0 : index
    %246 = vector.load %arg12[%c0_31, %c0_32] : memref<8x32xf32, #tpu.memory_space<vmem>>, vector<8x32xf32>
    tpu.vector_store %arg12[%c0_31, %c0_32], %242 {strides = array<i32>} : memref<8x32xf32, #tpu.memory_space<vmem>>, vector<8x32xf32>,
    %c0_33 = arith.constant 0 : index
    %c0_34 = arith.constant 0 : index
    %247 = vector.load %arg13[%c0_33, %c0_34] : memref<8x32xf32, #tpu.memory_space<vmem>>, vector<8x32xf32>
    tpu.vector_store %arg13[%c0_33, %c0_34], %245 {strides = array<i32>} : memref<8x32xf32, #tpu.memory_space<vmem>>, vector<8x32xf32>,
    %c0_i32_35 = arith.constant 0 : i32
    %248 = arith.cmpi eq, %arg1, %c0_i32_35 : i32
    %249 = arith.extui %248 : i1 to i32
    %c0_i32_36 = arith.constant 0 : i32
    %250 = arith.cmpi ne, %249, %c0_i32_36 : i32
    scf.if %250 {
      %251 = arith.truncf %242 : vector<8x32xf32> to vector<8x32xbf16>
      %c0_37 = arith.constant 0 : index
      %c0_38 = arith.constant 0 : index
      %252 = vector.load %arg7[%c0_37, %c0_38] : memref<32x32xbf16, #tpu.memory_space<vmem>>, vector<32x32xbf16>
      %cst_39 = arith.constant dense<0.000000e+00> : vector<8x32xf32>
      %253 = tpu.matmul %251, %252, %cst_39 {dimension_numbers = #tpu.dot_dimension_numbers<[1], [0], [0], [1], [0, 0, 1, 1], [], []>} : vector<8x32xbf16>, vector<32x32xbf16>, vector<8x32xf32> -> vector<8x32xf32>
      %c0_40 = arith.constant 0 : index
      %c0_41 = arith.constant 0 : index
      %254 = vector.load %arg8[%c0_40, %c0_41] : memref<1x32xf32, #tpu.memory_space<vmem>>, vector<1x32xf32>
      %255 = vector.broadcast %254 : vector<1x32xf32> to vector<8x32xf32>
      %256 = arith.addf %253, %255 : vector<8x32xf32>
      %cst_42 = arith.constant 0.000000e+00 : f32
      %257 = vector.broadcast %cst_42 : f32 to vector<8x32xf32>
      %258 = arith.maximumf %256, %257 : vector<8x32xf32>
      %259 = arith.truncf %258 : vector<8x32xf32> to vector<8x32xbf16>
      %c0_43 = arith.constant 0 : index
      %c0_44 = arith.constant 0 : index
      %260 = vector.load %arg9[%c0_43, %c0_44] : memref<32x128xbf16, #tpu.memory_space<vmem>>, vector<32x128xbf16>
      %cst_45 = arith.constant dense<0.000000e+00> : vector<8x128xf32>
      %261 = tpu.matmul %259, %260, %cst_45 {dimension_numbers = #tpu.dot_dimension_numbers<[1], [0], [0], [1], [0, 0, 1, 1], [], []>} : vector<8x32xbf16>, vector<32x128xbf16>, vector<8x128xf32> -> vector<8x128xf32>
      %c0_46 = arith.constant 0 : index
      %c0_47 = arith.constant 0 : index
      %262 = vector.load %arg10[%c0_46, %c0_47] : memref<1x128xf32, #tpu.memory_space<vmem>>, vector<1x128xf32>
      %263 = vector.broadcast %262 : vector<1x128xf32> to vector<8x128xf32>
      %264 = arith.addf %261, %263 : vector<8x128xf32>
      %c0_48 = arith.constant 0 : index
      %c0_49 = arith.constant 0 : index
      %265 = vector.load %arg11[%c0_48, %c0_49] : memref<8x128xf32, #tpu.memory_space<vmem>>, vector<8x128xf32>
      tpu.vector_store %arg11[%c0_48, %c0_49], %264 {strides = array<i32>} : memref<8x128xf32, #tpu.memory_space<vmem>>, vector<8x128xf32>,
    } else {
    }
    return
  }
  func.func @transform_0(%arg0: i32, %arg1: i32) -> (i32, i32, i32) {
    %c0_i32 = arith.constant 0 : i32
    %c0_i32_0 = arith.constant 0 : i32
    return %arg1, %arg0, %c0_i32 : i32, i32, i32
  }
  func.func @transform_1(%arg0: i32, %arg1: i32) -> (i32, i32) {
    %c0_i32 = arith.constant 0 : i32
    %c0_i32_0 = arith.constant 0 : i32
    return %arg0, %c0_i32 : i32, i32
  }
  func.func @transform_2(%arg0: i32, %arg1: i32) -> (i32, i32) {
    %c0_i32 = arith.constant 0 : i32
    %c0_i32_0 = arith.constant 0 : i32
    %c0_i32_1 = arith.constant 0 : i32
    return %c0_i32, %c0_i32_0 : i32, i32
  }
  func.func @transform_3(%arg0: i32, %arg1: i32) -> (i32, i32) {
    %c0_i32 = arith.constant 0 : i32
    %c0_i32_0 = arith.constant 0 : i32
    %c0_i32_1 = arith.constant 0 : i32
    return %c0_i32, %c0_i32_0 : i32, i32
  }
  func.func @transform_4(%arg0: i32, %arg1: i32) -> (i32, i32) {
    %c0_i32 = arith.constant 0 : i32
    %c0_i32_0 = arith.constant 0 : i32
    %c0_i32_1 = arith.constant 0 : i32
    return %c0_i32, %c0_i32_0 : i32, i32
  }
  func.func @transform_5(%arg0: i32, %arg1: i32) -> (i32, i32) {
    %c0_i32 = arith.constant 0 : i32
    %c0_i32_0 = arith.constant 0 : i32
    %c0_i32_1 = arith.constant 0 : i32
    return %c0_i32, %c0_i32_0 : i32, i32
  }
  func.func @transform_6(%arg0: i32, %arg1: i32) -> (i32, i32) {
    %c0_i32 = arith.constant 0 : i32
    %c0_i32_0 = arith.constant 0 : i32
    %c0_i32_1 = arith.constant 0 : i32
    return %c0_i32, %c0_i32_0 : i32, i32
  }
  func.func @transform_7(%arg0: i32, %arg1: i32) -> (i32, i32) {
    %c0_i32 = arith.constant 0 : i32
    %c0_i32_0 = arith.constant 0 : i32
    %c0_i32_1 = arith.constant 0 : i32
    return %c0_i32, %c0_i32_0 : i32, i32
  }
  func.func @transform_8(%arg0: i32, %arg1: i32) -> (i32, i32) {
    %c0_i32 = arith.constant 0 : i32
    %c0_i32_0 = arith.constant 0 : i32
    %c0_i32_1 = arith.constant 0 : i32
    return %c0_i32, %c0_i32_0 : i32, i32
  }
  func.func @transform_9(%arg0: i32, %arg1: i32) -> (i32, i32) {
    %c0_i32 = arith.constant 0 : i32
    %c0_i32_0 = arith.constant 0 : i32
    return %arg0, %c0_i32 : i32, i32
  }
}

</mosaic_0001>

<bundles_post_ra>
// kernel: tpu_custom_call.1
= control target key start
LH: loop header
LB: loop body
LE: loop exit
PB: predicated region body
PF: predicated region fallthrough
CT: control target
= control target key end

     0   :  { %14 = vsyncpa [#allocation5], 0  ;;  %s1689_s0 = inlined_call_operand.hbm [shape: f32[8,8,8], index: 0, kind: input, shape index: {}]   ;;  %s1690_s1 = inlined_call_operand.vmem [shape: s32[8,1], index: 1, kind: input, shape index: {}]   ;;  %s1691_s2 = inlined_call_operand.hbm [shape: bf16[8,128], index: 2, kind: input, shape index: {}]   ;;  %s1692_s3 = inlined_call_operand.vmem [shape: bf16[32,128], index: 3, kind: input, shape index: {}]   ;;  %s1693_s4 = inlined_call_operand.vmem [shape: f32[1,128], index: 4, kind: input, shape index: {}]   ;;  %s1694_s5 = inlined_call_operand.hbm [shape: bf16[32,32], index: 5, kind: input, shape index: {}]   ;;  %s1695_s6 = inlined_call_operand.vmem [shape: f32[1,32], index: 6, kind: input, shape index: {}]   ;;  %s1696_s7 = inlined_call_operand.vmem [shape: bf16[32,128], index: 7, kind: input, shape index: {}]   ;;  %s1697_s8 = inlined_call_operand.vmem [shape: f32[1,128], index: 8, kind: input, shape index: {}]   ;;  %s1698_s9 = inlined_call_operand.hbm [shape: f32[8,128], index: 9, kind: output, shape index: {}]  }
   0x1   :  { %15 = vsyncpa [#allocation8], 0 }
   0x2   :  { %16 = vsyncpa [#allocation6], 0  ;;  %s1368_s30 = smov [#allocation7]   ;;  %s1369_s11 = smov [#allocation4]  }
   0x3   :  { %s37_s10 = sshll.u32 %s1368_s30, 4  ;;  %s22_s12 = sshll.u32 %s1369_s11, 4  ;;  %s38_s10 = int_to_ptr.vmem [resolvable:$true] %s37_s10  ;;  %s1431_s12 = int_to_ptr.vmem [resolvable:$true] %s22_s12 }
   0x4   :  { %s1274_s15 = scalar_lea.hbm %s1691_s2, 64 }
   0x5   :  { %p1275_p0 = scmp.ne.s32.totalorder %s1691_s2, %s1274_s15  ;;  %p1278_p1 = scmp.lt.u32.totalorder %s1274_s15, %s1691_s2 }
   0x7   :  { %p1280_p2 = pnand %p1278_p1, %p1275_p0 }
   0x9   :  { %1283 = shalt.err (!%p1280_p2)
}
   0xa   :  { %s1284_s20 = scalar_lea.vmem %s38_s10, 64  ;;  %p1289_p4 = scmp.lt.s32.totalorder %s38_s10, %s38_s10 }
   0xb   :  { %p1285_p3 = scmp.ne.s32.totalorder %s38_s10, %s1284_s20  ;;  %p1290_p5 = scmp.lt.s32.totalorder %s1284_s20, %s1284_s20 }
   0xd   :  { %p1291_p6 = por %p1290_p5, %p1289_p4 }
   0xf   :  { %p1292_p7 = pnand %p1291_p6, %p1285_p3 }
  0x11   :  { %1295 = shalt.err (!%p1292_p7)
}
  0x12   :  { %40 = dma.hbm_to_vmem [thread:$0]  %s1691_s2, 64, %s38_s10, [#allocation8]  }
  0x13   :  { %s1296_s25 = scalar_lea.hbm %s1689_s0, 1024 }
  0x14   :  { %p1297_p8 = scmp.ne.s32.totalorder %s1689_s0, %s1296_s25  ;;  %p1300_p9 = scmp.lt.u32.totalorder %s1296_s25, %s1689_s0 }
  0x16   :  { %p1302_p10 = pnand %p1300_p9, %p1297_p8 }
  0x18   :  { %1305 = shalt.err (!%p1302_p10)
}
  0x19   :  { %s1306_s30 = scalar_lea.vmem %s1431_s12, 1024  ;;  %p1311_p12 = scmp.lt.s32.totalorder %s1431_s12, %s1431_s12 }
  0x1a   :  { %p1307_p11 = scmp.ne.s32.totalorder %s1431_s12, %s1306_s30  ;;  %p1312_p13 = scmp.lt.s32.totalorder %s1306_s30, %s1306_s30 }
  0x1c   :  { %p1313_p0 = por %p1312_p13, %p1311_p12 }
  0x1e   :  { %p1314_p1 = pnand %p1313_p0, %p1307_p11 }
  0x20   :  { %1317 = shalt.err (!%p1314_p1)
}
  0x21   :  { %s1370_s2 = smov 128   ;;  %s1371_s10 = smov 8  }
  0x22   :  { %28 = dma.hbm_to_vmem [thread:$0]  %s1689_s0, 1024, %s1431_s12, [#allocation5], %s1370_s2, %s1370_s2, %s1371_s10  }
  0x23   :  { %s1372_s14 = smov [#allocation9]   ;;  %s1318_s18 = scalar_lea.hbm %s1694_s5, 256 }
  0x24   :  { %s50_s15 = sshll.u32 %s1372_s14, 4  ;;  %p1319_p2 = scmp.ne.s32.totalorder %s1694_s5, %s1318_s18  ;;  %s51_s15 = int_to_ptr.vmem [resolvable:$true] %s50_s15 }
  0x25   :  { %p1322_p3 = scmp.lt.u32.totalorder %s1318_s18, %s1694_s5 }
  0x27   :  { %p1324_p4 = pnand %p1322_p3, %p1319_p2 }
  0x29   :  { %1327 = shalt.err (!%p1324_p4)
}
  0x2a   :  { %s1328_s23 = scalar_lea.vmem %s51_s15, 256  ;;  %p1333_p6 = scmp.lt.s32.totalorder %s51_s15, %s51_s15 }
  0x2b   :  { %p1329_p5 = scmp.ne.s32.totalorder %s51_s15, %s1328_s23  ;;  %p1334_p7 = scmp.lt.s32.totalorder %s1328_s23, %s1328_s23 }
  0x2d   :  { %p1335_p8 = por %p1334_p7, %p1333_p6 }
  0x2f   :  { %p1336_p9 = pnand %p1335_p8, %p1329_p5 }
  0x31   :  { %1339 = shalt.err (!%p1336_p9)
}
  0x32   :  { %s1373_s0 = smov 64   ;;  %s1374_s12 = smov 4  }
  0x33   :  { %56 = dma.hbm_to_vmem [thread:$0]  %s1694_s5, 256, %s51_s15, [#allocation8], %s1373_s0, %s1373_s0, %s1374_s12  }
  0x34   :  { %1362 = dma.done.wait [#allocation5], 1024  }
  0x35   :  { %1363 = vsyncadd [#allocation5], 4294966272 }
  0x36   :  { %1364 = dma.done.wait [#allocation8], 320  }
  0x37   :  { %1365 = vsyncadd [#allocation8], 4294966976  ;;  %v1375_v0 = vmov 0.0   ;;  %vm1376_vm0 = vmmov 0   ;;  %vm77_vm1 = vcmask 261120   ;;  %vm113_vm2 = vcmask 1043456  }
  0x38   :  { %1108 = vmatprep.subr.bf16.mxu1 %v1375_v0  ;;  %1112 = vmatprep.mubr.msk.bf16.mxu1 %vm1376_vm0, %v1375_v0  ;;  %78 = vst.msk [vmem:[#allocation2] sm:$0xff] %vm77_vm1, %v1375_v0  ;;  %79 = vst.msk [vmem:[#allocation3] sm:$0xff] %vm77_vm1, %v1375_v0  ;;  %v92_v1 = vld [vmem:[#allocation7] sm:$0xf]  ;;  %v1486_v3 = vld [vmem:[%s1692_s3] sm:$0xff]   ;;  %vm100_vm3 = vcmask 64512  }
  0x39   :  { %1188 = vmatprep.subr.msk.bf16.mxu0 %vm113_vm2, %v92_v1  ;;  %v115_v2 = vsel %vm113_vm2, %v92_v1, 0  ;;  %v80_v4 = vld [vmem:[#allocation4] sm:$0xff]  ;;  %v81_v5 = vld [vmem:[#allocation4 + $0x8] sm:$0xff]  ;;  %v82_v7 = vld [vmem:[#allocation4 + $0x10] sm:$0xff]  ;;  %1109 = vmatpush3.bf16.msra.mxu1 %v1486_v3  ;;  %v1377_v24 = vmov 0   ;;  %s1379_s11 = smov 96  }
  0x3a   :  { %1099 = vmatpush3.bf16.msra.mxu0 %v115_v2  ;;  %v88_v6 = vpack.c.bf16 %v81_v5, %v80_v4  ;;  %v83_v8 = vld [vmem:[#allocation4 + $0x18] sm:$0xff]  ;;  %1110 = vmatprep.subr.bf16.mxu1 %v1375_v0  ;;  %v1514_v13 = vld [vmem:[%s1693_s4] ss:$0 sm:$0xff]  ;;  %s1378_s4 = smov 32   ;;  %v84_v2 = vld [vmem:[#allocation4 + $0x20] sm:$0xff]  ;;  %s1380_s19 = smov [#allocation10]  }
  0x3b   :  { %v89_v9 = vpack.c.bf16 %v83_v8, %v82_v7  ;;  %v1492_v10 = vld [vmem:[%s1692_s3 + $0x8] sm:$0xff]   ;;  %1124 = vmatprep.subr.bf16.mxu0 %v1375_v0  ;;  %1202 = vset.pattern.permute.xlu1 %v1377_v24  ;;  %v1528_v30 = vld [vmem:[%s1690_s1] sm:$0xff]  ;;  %v85_v4 = vld [vmem:[#allocation4 + $0x28] sm:$0xff] }
  0x3c   :  { %1100 = vmatprep.mubr.msk.bf16.mxu0 %vm100_vm3, %v88_v6  ;;  %1203 = vset.pattern.permute.xlu0 %v1377_v24  ;;  %vm1029_vm4 = vcmp.gt.s32.totalorder %v1528_v30, 0  ;;  %vm1030_vm6 = vcmp.gt.s32.totalorder %v1528_v30, 1  ;;  %v86_v5 = vld [vmem:[#allocation4 + $0x30] sm:$0xff]  ;;  %v90_v6 = vpack.c.bf16 %v85_v4, %v84_v2  ;;  %v87_v7 = vld [vmem:[#allocation4 + $0x38] sm:$0xff]  ;;  %vm1031_vm8 = vcmp.gt.s32.totalorder %v1528_v30, 2 }
  0x3d   :  { %1101 = vmatmul.mubr.msk.bf16.vlgmr.msra.gmra.mrb[0].mxu0 %vm100_vm3, %v89_v9  ;;  %1111 = vmatpush3.bf16.msra.mxu1 %v1492_v10  ;;  %v292_v34 = vsel %vm1029_vm4, 1, %v1377_v24  ;;  %v375_v54 = vsel %vm1030_vm6, 1, %v1377_v24  ;;  %v91_v8 = vpack.c.bf16 %v87_v7, %v86_v5  ;;  %vm1032_vm10 = vcmp.gt.s32.totalorder %v1528_v30, 3 }
  0x3e   :  { %1125 = vmatpush3.bf16.msra.mxu0 %v1486_v3  ;;  %1116 = vmatprep.subr.bf16.mxu1 %v1375_v0  ;;  %vm1033_vm12 = vcmp.gt.s32.totalorder %v1528_v30, 4  ;;  %vm1034_vm14 = vcmp.gt.s32.totalorder %v1528_v30, 5  ;;  %vm1035_vm2 = vcmp.gt.s32.totalorder %v1528_v30, 6  ;;  %vm1036_vm4 = vcmp.gt.s32.totalorder %v1528_v30, 7 }
  0x3f   :  { %v204_v11 = vld [vmem:[#allocation2] sm:$0xff]  ;;  %1126 = vmatprep.subr.bf16.mxu0 %v1375_v0  ;;  %v205_v26 = vld [vmem:[#allocation3] sm:$0xff]  ;;  %1104 = vmatprep.mubr.msk.bf16.mxu0 %vm100_vm3, %v90_v6 }
  0x40   :  { %v206_v12 = vpack.c.bf16 %v204_v11, %v204_v11 }
  0x42   :  { %1113 = vmatmul.mubr.msk.bf16.vlgmr.msra.gmra.mrb[0].mxu1 %vm77_vm1, %v206_v12  ;;  %1127 = vmatpush3.bf16.msra.mxu0 %v1492_v10 }
  0x43   :  { %1117 = vmatpush3.bf16.msra.mxu1 %v1486_v3  ;;  %1120 = vmatprep.mubr.msk.bf16.mxu1 %vm1376_vm0, %v1375_v0 }
  0x44   :  { %1118 = vmatprep.subr.bf16.mxu1 %v1375_v0  ;;  %1140 = vmatprep.subr.bf16.mxu0 %v1375_v0 }
  0x45   :  { %1105 = vmatmul.mubr.msk.bf16.gmra.mrb[4].mxu0 %vm100_vm3, %v91_v8 }
  0x46   :  { %1128 = vmatprep.mubr.msk.bf16.mxu0 %vm1376_vm0, %v1375_v0 }
  0x47   :  { %1119 = vmatpush3.bf16.msra.mxu1 %v1492_v10 }
  0x48   :  { %1132 = vmatprep.subr.bf16.mxu1 %v1375_v0 }
 0x110   :  { %v1516_v14 = vpop.f32.mrb[0].mxu0 }
 0x111   :  { %v151_v15 = vpop.f32.mrb[1].mxu0 }
 0x112   :  { %v152_v16 = vadd.f32 %v1514_v13, %v151_v15  ;;  %v1519_v17 = vpop.f32.mrb[2].mxu0 }
 0x113   :  { %v154_v18 = vpop.f32.mrb[3].mxu0 }
 0x114   :  { %v155_v47 = vadd.f32 %v1514_v13, %v154_v18 }
 0x115   :  { %v257_v19 = vpop.f32.mrb[0].mxu1 }
 0x116   :  { %v263_v20 = vadd.f32 %v257_v19, %v152_v16  ;;  %v1114_v21 = vpop.f32.mrb[1].mxu1 }
 0x117   :  { %v260_v22 = vpop.f32.mrb[2].mxu1 }
 0x118   :  { %1210 = vtanh.f32 %v263_v20  ;;  %v1115_v23 = vpop.f32.mrb[3].mxu1  ;;  %v1040_v27 = vmul.f32 -1.442695, %v263_v20  ;;  %v1557_v19 = vpop.f32.mrb[4].mxu0 }
 0x119   :  { %v1559_v20 = vpop.f32.mrb[5].mxu0 }
 0x11a   :  { %1212 = vpow2.f32 %v1040_v27  ;;  %v1561_v21 = vpop.f32.mrb[6].mxu0 }
 0x11b   :  { %v1563_v22 = vpop.f32.mrb[7].mxu0 }
 0x122   :  { %v1211_v25 = vpop.eup %1210 }
 0x123   :  { %277 = vrot.lane.b32.xlu0 %v1211_v25, %s1378_s4  ;;  %v160_v25 = vadd.f32 %v1516_v14, %v1514_v13 }
 0x124   :  { %v1213_v28 = vpop.eup %1212 }
 0x125   :  { %v267_v29 = vadd.f32 1.0, %v1213_v28 }
 0x127   :  { %272 = vrot.lane.b32.xlu0 %v205_v26, %s1378_s4  ;;  %1214 = vrcp.f32 %v267_v29 }
 0x131   :  { %v1215_v31 = vpop.eup %1214 }
 0x195   :  { %v278_v32 = vpop.permute.xlu0 %277 }
 0x196   :  { %v280_v33 = vmul.f32 %v1215_v31, %v278_v32 }
 0x198   :  { %282 = vrot.lane.b32.xlu1 %v280_v33, %s1378_s4  ;;  %v454_v33 = vsel %vm1031_vm8, 1, %v1377_v24 }
 0x199   :  { %v273_v35 = vpop.permute.xlu0 %272 }
 0x19a   :  { %v275_v36 = vmul.f32 %v1215_v31, %v273_v35 }
 0x19c   :  { %294 = vperm.xlu1 %1202, %v292_v34  }
 0x1a0   :  { %298 = vrot.lane.b32.xlu1 %v204_v11, %s1373_s0 }
 0x20a   :  { %v283_v37 = vpop.permute.xlu1 %282 }
 0x20b   :  { %v285_v38 = vadd.f32 %v283_v37, %v275_v36 }
 0x20d   :  { %1216 = vtanh.f32 %v285_v38 }
 0x217   :  { %v1217_v39 = vpop.eup %1216 }
 0x218   :  { %288 = vrot.lane.b32.xlu0 %v1217_v39, %s1378_s4 }
 0x21b   :  { %v295_v40 = vpop.permute.xlu1 %294 }
 0x21c   :  { %vm296_vm5 = vcmp.eq.s32.totalorder %v295_v40, 1 }
 0x21d   :  { %v302_v61 = vsel %vm296_vm5, %v285_v38, %v273_v35 }
 0x21f   :  { %v299_v42 = vpop.permute.xlu1 %298 }
 0x28a   :  { %v289_v41 = vpop.permute.xlu0 %288 }
 0x28b   :  { %v291_v43 = vmul.f32 %v1215_v31, %v289_v41 }
 0x28d   :  { %v301_v44 = vsel %vm296_vm5, %v291_v43, %v299_v42 }
 0x28e   :  { %v303_v45 = vpack.c.bf16 %v301_v44, %v301_v44 }
 0x290   :  { %305 = vrot.lane.b32.xlu0 %v303_v45, %s1373_s0 }
 0x302   :  { %v306_v46 = vpop.permute.xlu0 %305 }
 0x303   :  { %1121 = vmatmul.mubr.msk.bf16.vlgmr.msra.gmra.mrb[4].mxu1 %vm77_vm1, %v306_v46 }
 0x304   :  { %1133 = vmatpush3.bf16.msra.mxu1 %v1486_v3  ;;  %1136 = vmatprep.mubr.msk.bf16.mxu1 %vm1376_vm0, %v1375_v0 }
 0x305   :  { %1134 = vmatprep.subr.bf16.mxu1 %v1375_v0 }
 0x308   :  { %1135 = vmatpush3.bf16.msra.mxu1 %v1492_v10 }
 0x309   :  { %1148 = vmatprep.subr.bf16.mxu1 %v1375_v0 }
 0x3d6   :  { %v344_v48 = vpop.f32.mrb[4].mxu1 }
 0x3d7   :  { %v350_v49 = vadd.f32 %v344_v48, %v155_v47  ;;  %v1122_v50 = vpop.f32.mrb[5].mxu1 }
 0x3d8   :  { %v347_v51 = vpop.f32.mrb[6].mxu1  ;;  %v163_v50 = vadd.f32 %v1519_v17, %v1514_v13 }
 0x3d9   :  { %1218 = vtanh.f32 %v350_v49  ;;  %v1123_v52 = vpop.f32.mrb[7].mxu1  ;;  %v1042_v55 = vmul.f32 -1.442695, %v350_v49 }
 0x3db   :  { %1220 = vpow2.f32 %v1042_v55 }
 0x3e3   :  { %v1219_v53 = vpop.eup %1218 }
 0x3e4   :  { %360 = vrot.lane.b32.xlu1 %v1219_v53, %s1378_s4 }
 0x3e5   :  { %v1221_v56 = vpop.eup %1220 }
 0x3e6   :  { %v354_v57 = vadd.f32 1.0, %v1221_v56 }
 0x3e8   :  { %377 = vperm.xlu1 %1202, %v375_v54   ;;  %1222 = vrcp.f32 %v354_v57  ;;  %v533_v57 = vsel %vm1032_vm10, 1, %v1377_v24 }
 0x3f2   :  { %v1223_v58 = vpop.eup %1222 }
 0x3f3   :  { %v358_v62 = vmul.f32 %v1223_v58, %v302_v61 }
 0x456   :  { %v361_v59 = vpop.permute.xlu1 %360 }
 0x457   :  { %v363_v60 = vmul.f32 %v1223_v58, %v361_v59 }
 0x459   :  { %365 = vrot.lane.b32.xlu0 %v363_v60, %s1378_s4 }
 0x467   :  { %v378_v11 = vpop.permute.xlu1 %377 }
 0x468   :  { %vm379_vm7 = vcmp.eq.s32.totalorder %v378_v11, 1 }
 0x4cb   :  { %v366_v63 = vpop.permute.xlu0 %365 }
 0x4cc   :  { %v368_v1 = vadd.f32 %v366_v63, %v358_v62 }
 0x4ce   :  { %1224 = vtanh.f32 %v368_v1  ;;  %v381_v39 = vsel %vm379_vm7, %v368_v1, %v302_v61 }
 0x4d8   :  { %v1225_v9 = vpop.eup %1224 }
 0x4d9   :  { %371 = vrot.lane.b32.xlu0 %v1225_v9, %s1378_s4 }
 0x54b   :  { %v372_v12 = vpop.permute.xlu0 %371 }
 0x54c   :  { %v374_v15 = vmul.f32 %v1223_v58, %v372_v12 }
 0x54e   :  { %v380_v16 = vsel %vm379_vm7, %v374_v15, %v301_v44  ;;  %v168_v15 = vadd.f32 %v1514_v13, %v1559_v20 }
 0x54f   :  { %v382_v18 = vpack.c.bf16 %v380_v16, %v380_v16 }
 0x551   :  { %384 = vrot.lane.b32.xlu1 %v382_v18, %s1373_s0 }
 0x5c3   :  { %v385_v23 = vpop.permute.xlu1 %384 }
 0x5c4   :  { %1129 = vmatmul.mubr.msk.bf16.vlgmr.msra.gmra.mrb[8].mxu0 %vm77_vm1, %v385_v23 }
 0x5c5   :  { %1141 = vmatpush3.bf16.msra.mxu0 %v1486_v3  ;;  %1144 = vmatprep.mubr.msk.bf16.mxu0 %vm1376_vm0, %v1375_v0 }
 0x5c6   :  { %1142 = vmatprep.subr.bf16.mxu0 %v1375_v0 }
 0x5c9   :  { %1143 = vmatpush3.bf16.msra.mxu0 %v1492_v10 }
 0x5ca   :  { %1156 = vmatprep.subr.bf16.mxu0 %v1375_v0 }
 0x697   :  { %v423_v26 = vpop.f32.mrb[8].mxu0 }
 0x698   :  { %v429_v27 = vadd.f32 %v423_v26, %v160_v25  ;;  %v1130_v28 = vpop.f32.mrb[9].mxu0 }
 0x699   :  { %v426_v29 = vpop.f32.mrb[10].mxu0  ;;  %v612_v28 = vsel %vm1033_vm12, 1, %v1377_v24 }
 0x69a   :  { %1226 = vtanh.f32 %v429_v27  ;;  %v1131_v31 = vpop.f32.mrb[11].mxu0  ;;  %v1044_v34 = vmul.f32 -1.442695, %v429_v27 }
 0x69c   :  { %1228 = vpow2.f32 %v1044_v34 }
 0x6a4   :  { %v1227_v32 = vpop.eup %1226 }
 0x6a5   :  { %439 = vrot.lane.b32.xlu0 %v1227_v32, %s1378_s4 }
 0x6a6   :  { %v1229_v35 = vpop.eup %1228 }
 0x6a7   :  { %v433_v36 = vadd.f32 1.0, %v1229_v35 }
 0x6a9   :  { %456 = vperm.xlu0 %1203, %v454_v33   ;;  %1230 = vrcp.f32 %v433_v36 }
 0x6b3   :  { %v1231_v14 = vpop.eup %1230 }
 0x6b4   :  { %v437_v40 = vmul.f32 %v1231_v14, %v381_v39 }
 0x717   :  { %v440_v37 = vpop.permute.xlu0 %439 }
 0x718   :  { %v442_v38 = vmul.f32 %v1231_v14, %v440_v37 }
 0x71a   :  { %444 = vrot.lane.b32.xlu1 %v442_v38, %s1378_s4 }
 0x728   :  { %v457_v44 = vpop.permute.xlu0 %456 }
 0x729   :  { %vm458_vm9 = vcmp.eq.s32.totalorder %v457_v44, 1 }
 0x78c   :  { %v445_v41 = vpop.permute.xlu1 %444 }
 0x78d   :  { %v447_v42 = vadd.f32 %v445_v41, %v437_v40 }
 0x78f   :  { %1232 = vtanh.f32 %v447_v42  ;;  %v460_v63 = vsel %vm458_vm9, %v447_v42, %v381_v39 }
 0x799   :  { %v1233_v43 = vpop.eup %1232 }
 0x79a   :  { %450 = vrot.lane.b32.xlu1 %v1233_v43, %s1378_s4 }
 0x80c   :  { %v451_v45 = vpop.permute.xlu1 %450 }
 0x80d   :  { %v453_v46 = vmul.f32 %v1231_v14, %v451_v45  ;;  %v171_v45 = vadd.f32 %v1514_v13, %v1563_v22 }
 0x80f   :  { %v459_v47 = vsel %vm458_vm9, %v453_v46, %v380_v16 }
 0x810   :  { %v461_v48 = vpack.c.bf16 %v459_v47, %v459_v47 }
 0x812   :  { %463 = vrot.lane.b32.xlu1 %v461_v48, %s1373_s0 }
 0x884   :  { %v464_v49 = vpop.permute.xlu1 %463 }
 0x885   :  { %1137 = vmatmul.mubr.msk.bf16.vlgmr.msra.gmra.mrb[8].mxu1 %vm77_vm1, %v464_v49 }
 0x886   :  { %1149 = vmatpush3.bf16.msra.mxu1 %v1486_v3  ;;  %1152 = vmatprep.mubr.msk.bf16.mxu1 %vm1376_vm0, %v1375_v0 }
 0x887   :  { %1150 = vmatprep.subr.bf16.mxu1 %v1375_v0 }
 0x88a   :  { %1151 = vmatpush3.bf16.msra.mxu1 %v1492_v10 }
 0x88b   :  { %1164 = vmatprep.subr.bf16.mxu1 %v1375_v0 }
 0x958   :  { %v502_v51 = vpop.f32.mrb[8].mxu1 }
 0x959   :  { %v508_v52 = vadd.f32 %v502_v51, %v163_v50  ;;  %v1138_v53 = vpop.f32.mrb[9].mxu1  ;;  %v691_v51 = vsel %vm1034_vm14, 1, %v1377_v24 }
 0x95a   :  { %v505_v54 = vpop.f32.mrb[10].mxu1 }
 0x95b   :  { %1234 = vtanh.f32 %v508_v52  ;;  %v1139_v55 = vpop.f32.mrb[11].mxu1  ;;  %v1046_v58 = vmul.f32 -1.442695, %v508_v52 }
 0x95d   :  { %1236 = vpow2.f32 %v1046_v58 }
 0x965   :  { %v1235_v56 = vpop.eup %1234 }
 0x966   :  { %518 = vrot.lane.b32.xlu0 %v1235_v56, %s1378_s4 }
 0x967   :  { %v1237_v59 = vpop.eup %1236 }
 0x968   :  { %v512_v60 = vadd.f32 1.0, %v1237_v59 }
 0x96a   :  { %535 = vperm.xlu0 %1203, %v533_v57   ;;  %1238 = vrcp.f32 %v512_v60 }
 0x974   :  { %v1239_v17 = vpop.eup %1238 }
 0x975   :  { %v516_v1 = vmul.f32 %v1239_v17, %v460_v63 }
 0x9d8   :  { %v519_v61 = vpop.permute.xlu0 %518 }
 0x9d9   :  { %v521_v62 = vmul.f32 %v1239_v17, %v519_v61 }
 0x9db   :  { %523 = vrot.lane.b32.xlu1 %v521_v62, %s1378_s4 }
 0x9e9   :  { %v536_v6 = vpop.permute.xlu0 %535 }
 0x9ea   :  { %vm537_vm11 = vcmp.eq.s32.totalorder %v536_v6, 1 }
 0xa4d   :  { %v524_v2 = vpop.permute.xlu1 %523 }
 0xa4e   :  { %v526_v4 = vadd.f32 %v524_v2, %v516_v1 }
 0xa50   :  { %1240 = vtanh.f32 %v526_v4  ;;  %v539_v35 = vsel %vm537_vm11, %v526_v4, %v460_v63  ;;  %v176_v4 = vadd.f32 %v1557_v19, %v1514_v13 }
 0xa5a   :  { %v1241_v5 = vpop.eup %1240 }
 0xa5b   :  { %529 = vrot.lane.b32.xlu1 %v1241_v5, %s1378_s4 }
 0xacd   :  { %v530_v7 = vpop.permute.xlu1 %529 }
 0xace   :  { %v532_v8 = vmul.f32 %v1239_v17, %v530_v7 }
 0xad0   :  { %v538_v9 = vsel %vm537_vm11, %v532_v8, %v459_v47 }
 0xad1   :  { %v540_v11 = vpack.c.bf16 %v538_v9, %v538_v9 }
 0xad3   :  { %542 = vrot.lane.b32.xlu0 %v540_v11, %s1373_s0 }
 0xb45   :  { %v543_v12 = vpop.permute.xlu0 %542 }
 0xb46   :  { %1145 = vmatmul.mubr.msk.bf16.vlgmr.msra.gmra.mrb[12].mxu0 %vm77_vm1, %v543_v12  ;;  %v770_v12 = vsel %vm1035_vm2, 1, %v1377_v24 }
 0xb47   :  { %1157 = vmatpush3.bf16.msra.mxu0 %v1486_v3  ;;  %1160 = vmatprep.mubr.msk.bf16.mxu0 %vm1376_vm0, %v1375_v0 }
 0xb48   :  { %1158 = vmatprep.subr.bf16.mxu0 %v1375_v0 }
 0xb4b   :  { %1159 = vmatpush3.bf16.msra.mxu0 %v1492_v10 }
 0xb4c   :  { %1172 = vmatprep.subr.bf16.mxu0 %v1375_v0 }
 0xc19   :  { %v581_v16 = vpop.f32.mrb[12].mxu0 }
 0xc1a   :  { %v587_v18 = vadd.f32 %v581_v16, %v168_v15  ;;  %v1146_v23 = vpop.f32.mrb[13].mxu0 }
 0xc1b   :  { %v584_v25 = vpop.f32.mrb[14].mxu0 }
 0xc1c   :  { %1242 = vtanh.f32 %v587_v18  ;;  %v1147_v26 = vpop.f32.mrb[15].mxu0  ;;  %v1048_v29 = vmul.f32 -1.442695, %v587_v18 }
 0xc1e   :  { %1244 = vpow2.f32 %v1048_v29 }
 0xc26   :  { %v1243_v27 = vpop.eup %1242 }
 0xc27   :  { %597 = vrot.lane.b32.xlu1 %v1243_v27, %s1378_s4 }
 0xc28   :  { %v1245_v31 = vpop.eup %1244 }
 0xc29   :  { %v591_v32 = vadd.f32 1.0, %v1245_v31 }
 0xc2b   :  { %614 = vperm.xlu1 %1202, %v612_v28   ;;  %1246 = vrcp.f32 %v591_v32 }
 0xc35   :  { %v1247_v20 = vpop.eup %1246 }
 0xc36   :  { %v595_v36 = vmul.f32 %v1247_v20, %v539_v35 }
 0xc99   :  { %v598_v33 = vpop.permute.xlu1 %597 }
 0xc9a   :  { %v600_v34 = vmul.f32 %v1247_v20, %v598_v33 }
 0xc9c   :  { %602 = vrot.lane.b32.xlu0 %v600_v34, %s1378_s4 }
 0xcaa   :  { %v615_v39 = vpop.permute.xlu1 %614 }
 0xcab   :  { %vm616_vm13 = vcmp.eq.s32.totalorder %v615_v39, 1 }
 0xd0e   :  { %v603_v14 = vpop.permute.xlu0 %602 }
 0xd0f   :  { %v605_v37 = vadd.f32 %v603_v14, %v595_v36  ;;  %v179_v14 = vadd.f32 %v1561_v21, %v1514_v13 }
 0xd11   :  { %1248 = vtanh.f32 %v605_v37  ;;  %v618_v56 = vsel %vm616_vm13, %v605_v37, %v539_v35 }
 0xd1b   :  { %v1249_v38 = vpop.eup %1248 }
 0xd1c   :  { %608 = vrot.lane.b32.xlu0 %v1249_v38, %s1378_s4 }
 0xd8e   :  { %v609_v40 = vpop.permute.xlu0 %608 }
 0xd8f   :  { %v611_v41 = vmul.f32 %v1247_v20, %v609_v40 }
 0xd91   :  { %v617_v42 = vsel %vm616_vm13, %v611_v41, %v538_v9 }
 0xd92   :  { %v619_v43 = vpack.c.bf16 %v617_v42, %v617_v42 }
 0xd94   :  { %621 = vrot.lane.b32.xlu1 %v619_v43, %s1373_s0  ;;  %v849_v43 = vsel %vm1036_vm4, 1, %v1377_v24  ;;  %v1207_v24 = vld [vmem:[#allocation9 + $0x8] sm:$0xff]  }
 0xe06   :  { %v622_v44 = vpop.permute.xlu1 %621 }
 0xe07   :  { %1153 = vmatmul.mubr.msk.bf16.vlgmr.msra.gmra.mrb[12].mxu1 %vm77_vm1, %v622_v44 }
 0xe08   :  { %1165 = vmatpush3.bf16.msra.mxu1 %v1486_v3  ;;  %1168 = vmatprep.mubr.msk.bf16.mxu1 %vm1376_vm0, %v1375_v0 }
 0xe09   :  { %1166 = vmatprep.subr.bf16.mxu1 %v1375_v0 }
 0xe0c   :  { %1167 = vmatpush3.bf16.msra.mxu1 %v1492_v10 }
 0xe0d   :  { %1180 = vmatprep.subr.bf16.mxu1 %v1375_v0 }
 0xeda   :  { %v660_v46 = vpop.f32.mrb[12].mxu1 }
 0xedb   :  { %v666_v47 = vadd.f32 %v660_v46, %v171_v45  ;;  %v1154_v48 = vpop.f32.mrb[13].mxu1 }
 0xedc   :  { %v663_v49 = vpop.f32.mrb[14].mxu1 }
 0xedd   :  { %1250 = vtanh.f32 %v666_v47  ;;  %v1155_v50 = vpop.f32.mrb[15].mxu1  ;;  %v1050_v10 = vmul.f32 -1.442695, %v666_v47 }
 0xedf   :  { %1252 = vpow2.f32 %v1050_v10  ;;  %v1208_v10 = vld [vmem:[%s1696_s7] sm:$0xff]  }
 0xee7   :  { %v1251_v3 = vpop.eup %1250 }
 0xee8   :  { %676 = vrot.lane.b32.xlu0 %v1251_v3, %s1378_s4  ;;  %v1206_v3 = vld [vmem:[#allocation9] sm:$0xff]  }
 0xee9   :  { %v1253_v52 = vpop.eup %1252 }
 0xeea   :  { %v670_v53 = vadd.f32 1.0, %v1253_v52 }
 0xeec   :  { %693 = vperm.xlu0 %1203, %v691_v51   ;;  %1254 = vrcp.f32 %v670_v53 }
 0xef6   :  { %v1255_v22 = vpop.eup %1254 }
 0xef7   :  { %v674_v57 = vmul.f32 %v1255_v22, %v618_v56 }
 0xf5a   :  { %v677_v54 = vpop.permute.xlu0 %676 }
 0xf5b   :  { %v679_v55 = vmul.f32 %v1255_v22, %v677_v54 }
 0xf5d   :  { %681 = vrot.lane.b32.xlu1 %v679_v55, %s1378_s4 }
 0xf6b   :  { %v694_v17 = vpop.permute.xlu0 %693 }
 0xf6c   :  { %vm695_vm15 = vcmp.eq.s32.totalorder %v694_v17, 1 }
 0xfcf   :  { %v682_v58 = vpop.permute.xlu1 %681 }
 0xfd0   :  { %v684_v59 = vadd.f32 %v682_v58, %v674_v57 }
 0xfd2   :  { %1256 = vtanh.f32 %v684_v59  ;;  %v697_v26 = vsel %vm695_vm15, %v684_v59, %v618_v56 }
 0xfdc   :  { %v1257_v60 = vpop.eup %1256 }
 0xfdd   :  { %687 = vrot.lane.b32.xlu1 %v1257_v60, %s1378_s4  ;;  %v1055_v60 = vld [vmem:[%s1695_s6] ss:$0 sm:$0xff] }
0x104f   :  { %v688_v61 = vpop.permute.xlu1 %687 }
0x1050   :  { %v690_v62 = vmul.f32 %v1255_v22, %v688_v61 }
0x1052   :  { %v696_v63 = vsel %vm695_vm15, %v690_v62, %v617_v42 }
0x1053   :  { %v698_v1 = vpack.c.bf16 %v696_v63, %v696_v63 }
0x1055   :  { %700 = vrot.lane.b32.xlu0 %v698_v1, %s1373_s0 }
0x10c7   :  { %v701_v2 = vpop.permute.xlu0 %700 }
0x10c8   :  { %1161 = vmatmul.mubr.msk.bf16.vlgmr.msra.gmra.mrb[16].mxu0 %vm77_vm1, %v701_v2 }
0x10c9   :  { %1176 = vmatprep.mubr.msk.bf16.mxu0 %vm1376_vm0, %v1375_v0  ;;  %1173 = vmatpush3.bf16.msra.mxu0 %v1206_v3 }
0x10ca   :  { %1174 = vmatprep.subr.bf16.mxu0 %v1375_v0 }
0x10cd   :  { %1175 = vmatpush3.bf16.msra.mxu0 %v1207_v24 }
0x119b   :  { %v739_v5 = vpop.f32.mrb[16].mxu0 }
0x119c   :  { %v745_v6 = vadd.f32 %v739_v5, %v176_v4  ;;  %v1162_v7 = vpop.f32.mrb[17].mxu0  ;;  %v1059_v5 = vld [vmem:[%s1697_s8] ss:$0 sm:$0xff] }
0x119d   :  { %v742_v8 = vpop.f32.mrb[18].mxu0 }
0x119e   :  { %1258 = vtanh.f32 %v745_v6  ;;  %v1163_v9 = vpop.f32.mrb[19].mxu0  ;;  %v1052_v15 = vmul.f32 -1.442695, %v745_v6 }
0x11a0   :  { %1260 = vpow2.f32 %v1052_v15 }
0x11a8   :  { %v1259_v11 = vpop.eup %1258 }
0x11a9   :  { %755 = vrot.lane.b32.xlu1 %v1259_v11, %s1378_s4 }
0x11aa   :  { %v1261_v16 = vpop.eup %1260 }
0x11ab   :  { %v749_v18 = vadd.f32 1.0, %v1261_v16 }
0x11ad   :  { %772 = vperm.xlu1 %1202, %v770_v12   ;;  %1262 = vrcp.f32 %v749_v18 }
0x11b7   :  { %v1263_v19 = vpop.eup %1262 }
0x11b8   :  { %v753_v27 = vmul.f32 %v1263_v19, %v697_v26 }
0x121b   :  { %v756_v23 = vpop.permute.xlu1 %755 }
0x121c   :  { %v758_v25 = vmul.f32 %v1263_v19, %v756_v23 }
0x121e   :  { %760 = vrot.lane.b32.xlu0 %v758_v25, %s1378_s4 }
0x122c   :  { %v773_v32 = vpop.permute.xlu1 %772 }
0x122d   :  { %vm774_vm3 = vcmp.eq.s32.totalorder %v773_v32, 1 }
0x1290   :  { %v761_v28 = vpop.permute.xlu0 %760 }
0x1291   :  { %v763_v29 = vadd.f32 %v761_v28, %v753_v27 }
0x1293   :  { %1264 = vtanh.f32 %v763_v29  ;;  %v776_v48 = vsel %vm774_vm3, %v763_v29, %v697_v26 }
0x129d   :  { %v1265_v31 = vpop.eup %1264 }
0x129e   :  { %766 = vrot.lane.b32.xlu0 %v1265_v31, %s1378_s4 }
0x1310   :  { %v767_v20 = vpop.permute.xlu0 %766 }
0x1311   :  { %v769_v33 = vmul.f32 %v1263_v19, %v767_v20 }
0x1313   :  { %v775_v34 = vsel %vm774_vm3, %v769_v33, %v696_v63 }
0x1314   :  { %v777_v35 = vpack.c.bf16 %v775_v34, %v775_v34 }
0x1316   :  { %779 = vrot.lane.b32.xlu1 %v777_v35, %s1373_s0 }
0x1388   :  { %v780_v36 = vpop.permute.xlu1 %779 }
0x1389   :  { %1169 = vmatmul.mubr.msk.bf16.vlgmr.msra.gmra.mrb[16].mxu1 %vm77_vm1, %v780_v36 }
0x138a   :  { %1184 = vmatprep.mubr.msk.bf16.mxu1 %vm1376_vm0, %v1375_v0  ;;  %1181 = vmatpush3.bf16.msra.mxu1 %v1208_v10 }
0x138b   :  { %1182 = vmatprep.subr.bf16.mxu1 %v1375_v0  ;;  %v1209_v0 = vld [vmem:[%s1696_s7 + $0x8] sm:$0xff]   ;;  %s1014_s7 = sshll.u32 %s1380_s19, 4  ;;  %s1015_s7 = int_to_ptr.vmem [resolvable:$true] %s1014_s7 }
0x138c   :  { %s1340_s6 = scalar_lea.vmem %s1015_s7, 128  ;;  %p1345_p11 = scmp.lt.s32.totalorder %s1015_s7, %s1015_s7 }
0x138d   :  { %p1341_p10 = scmp.ne.s32.totalorder %s1015_s7, %s1340_s6  ;;  %p1346_p12 = scmp.lt.s32.totalorder %s1340_s6, %s1340_s6 }
0x138e   :  { %1183 = vmatpush3.bf16.msra.mxu1 %v1209_v0 }
0x138f   :  { %p1347_p13 = por %p1346_p12, %p1345_p11 }
0x1391   :  { %p1348_p0 = pnand %p1347_p13, %p1341_p10 }
0x145c   :  { %v818_v37 = vpop.f32.mrb[16].mxu1 }
0x145d   :  { %v824_v38 = vadd.f32 %v818_v37, %v179_v14  ;;  %v1170_v39 = vpop.f32.mrb[17].mxu1 }
0x145e   :  { %v821_v40 = vpop.f32.mrb[18].mxu1 }
0x145f   :  { %1266 = vtanh.f32 %v824_v38  ;;  %v1171_v41 = vpop.f32.mrb[19].mxu1  ;;  %v1054_v44 = vmul.f32 -1.442695, %v824_v38 }
0x1461   :  { %1268 = vpow2.f32 %v1054_v44 }
0x1469   :  { %v1267_v42 = vpop.eup %1266 }
0x146a   :  { %834 = vrot.lane.b32.xlu0 %v1267_v42, %s1378_s4 }
0x146b   :  { %v1269_v45 = vpop.eup %1268 }
0x146c   :  { %v828_v46 = vadd.f32 1.0, %v1269_v45 }
0x146e   :  { %851 = vperm.xlu0 %1203, %v849_v43   ;;  %1270 = vrcp.f32 %v828_v46 }
0x1478   :  { %v1271_v13 = vpop.eup %1270 }
0x1479   :  { %v832_v49 = vmul.f32 %v1271_v13, %v776_v48 }
0x14dc   :  { %v835_v21 = vpop.permute.xlu0 %834 }
0x14dd   :  { %v837_v47 = vmul.f32 %v1271_v13, %v835_v21 }
0x14df   :  { %839 = vrot.lane.b32.xlu1 %v837_v47, %s1378_s4 }
0x14ed   :  { %v852_v52 = vpop.permute.xlu0 %851 }
0x14ee   :  { %vm853_vm0 = vcmp.eq.s32.totalorder %v852_v52, 1 }
0x1551   :  { %v840_v30 = vpop.permute.xlu1 %839 }
0x1552   :  { %v842_v50 = vadd.f32 %v840_v30, %v832_v49 }
0x1554   :  { %1272 = vtanh.f32 %v842_v50  ;;  %v855_v56 = vsel %vm853_vm0, %v842_v50, %v776_v48 }
0x155e   :  { %v1273_v51 = vpop.eup %1272 }
0x155f   :  { %845 = vrot.lane.b32.xlu1 %v1273_v51, %s1378_s4 }
0x15d1   :  { %v846_v53 = vpop.permute.xlu1 %845 }
0x15d2   :  { %v848_v22 = vmul.f32 %v1271_v13, %v846_v53 }
0x15d4   :  { %v854_v54 = vsel %vm853_vm0, %v848_v22, %v775_v34 }
0x15d5   :  { %857 = vrot.lane.b32.xlu1 %v854_v54, %s1373_s0  ;;  %v869_v55 = vpack.c.bf16 %v854_v54, %v854_v54 }
0x15d7   :  { %882 = vrot.lane.b32.xlu0 %v869_v55, %s1373_s0 }
0x15db   :  { %862 = vrot.lane.b32.xlu0 %v855_v56, %s1379_s11 }
0x1647   :  { %v858_v57 = vpop.permute.xlu1 %857 }
0x1648   :  { %860 = vst.msk [vmem:[#allocation2] sm:$0xff] %vm77_vm1, %v858_v57 }
0x1649   :  { %v883_v58 = vpop.permute.xlu0 %882 }
0x164a   :  { %1177 = vmatmul.mubr.msk.bf16.vlgmr.msra.gmra.mrb[20].mxu0 %vm77_vm1, %v883_v58 }
0x164d   :  { %v863_v59 = vpop.permute.xlu0 %862 }
0x164e   :  { %865 = vst.msk [vmem:[#allocation3] sm:$0xff] %vm77_vm1, %v863_v59 }
0x171d   :  { %v933_v17 = vpop.f32.mrb[20].mxu0 }
0x171e   :  { %v934_v61 = vadd.f32 %v1055_v60, %v933_v17  ;;  %v1178_v62 = vpop.f32.mrb[21].mxu0 }
0x171f   :  { %v936_v63 = vpop.f32.mrb[22].mxu0 }
0x1720   :  { %v939_v1 = vmax.f32 %v934_v61, 0.0  ;;  %v1179_v2 = vpop.f32.mrb[23].mxu0 }
0x1722   :  { %v940_v4 = vpack.c.bf16 %v939_v1, %v939_v1 }
0x1724   :  { %1185 = vmatmul.mubr.msk.bf16.vlgmr.msra.gmra.mrb[20].mxu1 %vm77_vm1, %v940_v4 }
0x17f7   :  { %v1001_v6 = vpop.f32.mrb[20].mxu1 }
0x17f8   :  { %v1002_v7 = vadd.f32 %v1059_v5, %v1001_v6  ;;  %v1186_v8 = vpop.f32.mrb[21].mxu1 }
0x17f9   :  { %v1004_v9 = vpop.f32.mrb[22].mxu1 }
0x17fa   :  { %1007 = vst [vmem:[#allocation10] sm:$0xff] %v1002_v7  ;;  %v1187_v11 = vpop.f32.mrb[23].mxu1 }
0x17fb   :  { %1351 = shalt.err (!%p1348_p0)
}
0x17fc   :  { %s1352_s8 = scalar_lea.hbm %s1698_s9, 128 }
0x17fd   :  { %p1353_p1 = scmp.ne.s32.totalorder %s1698_s9, %s1352_s8  ;;  %p1356_p2 = scmp.lt.u32.totalorder %s1352_s8, %s1698_s9 }
0x17ff   :  { %p1358_p3 = pnand %p1356_p2, %p1353_p1 }
0x1801   :  { %1361 = shalt.err (!%p1358_p3)
}
0x1802   :  { %1017 = dma.vmem_to_hbm [thread:$0]  %s1015_s7, 128, %s1698_s9, [#allocation6]  }
0x1803   :  { %1366 = dma.done.wait [#allocation6], 128  }
0x1804   :  { %1367 = vsyncadd [#allocation6], 4294967168 }
0x1805   :  { %1021 = vsyncpa [#allocation5], 1 }
0x1806   :  { %1022 = vsyncpa [#allocation8], 1 }
0x1807   :  { %1023 = vsyncpa [#allocation6], 1 }

</bundles_post_ra>
